<compile_context>
chip_gen: v5e
topology: v5e:2x2
jax: 0.10.0
libtpu: 0.0.40
codegen_flags: <defaults>
</compile_context>

<pallas_src>
import math
import functools

import numpy as np
import jax
import jax.numpy as jnp
from jax.experimental import pallas as pl
from jax.experimental.pallas import tpu as pltpu

N_FLOW = 3
N_BLOCK = 3
FILTER_SIZE = 32
LN2PI = math.log(2.0 * math.pi)
LN2 = math.log(2.0)
EPS = 1e-6


# ----------------------------- in-kernel helpers -----------------------------

def _actnorm_stats(x):
    mean = jnp.mean(x, axis=0, keepdims=True)
    ex2 = jnp.mean(x * x, axis=0, keepdims=True)
    var = jnp.maximum(ex2 - mean * mean, 0.0)
    std_eps = jnp.sqrt(var) + EPS
    return mean, std_eps


def _actnorm_ddi(x):
    """ActNorm with data-dependent init: out = (x - mean) / (std + eps).
    logdet = H*W*sum(logs) = -sum(log(std + eps)) with H = W = 1."""
    mean, std_eps = _actnorm_stats(x)
    out = (x - mean) * pl.reciprocal(std_eps, approx=False)
    return out, -jnp.sum(jnp.log(std_eps))


def _actnorm_ddi_nologdet(x):
    mean, std_eps = _actnorm_stats(x)
    return (x - mean) * pl.reciprocal(std_eps, approx=False)


def _normal_logp(v):
    """Standard-normal log-prob summed per sample -> (B, 1)."""
    return jnp.sum(-0.5 * v * v - 0.5 * LN2PI, axis=1, keepdims=True)


# ----------------------------- static plan ----------------------------------
# Channel reversals (InvConv2d) only permute channels; ActNorm is per-channel
# and therefore permutation-equivariant.  We track the reversal state in
# Python ("flipped": logical layout == physical layout reversed) so the kernel
# never moves data for InvConv2d.  The residual permutation is applied once at
# the end via a constant matrix; coupling weights are pre-permuted at pack
# time for the flows where the layout is flipped.

def make_plan(in_channel, n_flow, n_block):
    flows, blocks, out_pieces = [], [], []
    flipped = False
    n = in_channel
    for b in range(n_block):
        assert n % 2 == 0, "channel count must stay even through all blocks"
        half = n // 2
        split = b < n_block - 1
        for _ in range(n_flow):
            flipped = not flipped            # InvConv2d = channel reversal
            flows.append(dict(half=half, flip=flipped))
        blocks.append(dict(n=n, split=split, eps_is_L=flipped))
        if split:
            out_pieces.append((half, flipped))   # eps piece (reversed iff flipped)
            n = half
    out_pieces.append((n, flipped))              # final z piece
    return dict(n_flow=n_flow, flows=flows, blocks=blocks,
                out_pieces=out_pieces, max_half=in_channel // 2)


def build_perm(plan, in_channel):
    """out[:, j] = assembled[:, perm[j]]  ->  P with out = assembled @ P."""
    P = np.zeros((in_channel, in_channel), np.float32)
    off = 0
    for width, rev in plan["out_pieces"]:
        for i in range(width):
            src = off + (width - 1 - i if rev else i)
            P[src, off + i] = 1.0
        off += width
    assert off == in_channel
    return P


# ----------------------------- Pallas kernels --------------------------------

def _glow_fast_kernel(plan, emb_ref, perm_ref, z_ref, loss_ref):
    """Fresh-module first forward: ZeroConv2d params are zero, so every
    coupling shift is exactly 0 and each Flow reduces to ActNorm (the reversal
    is folded into the final output permutation)."""
    B, C = emb_ref.shape
    x = emb_ref[...]
    logdet = jnp.float32(0.0)               # sum of flow ActNorm logdets
    per_batch = jnp.zeros((B, 1), jnp.float32)
    pieces = []
    for blk in plan["blocks"]:
        n = blk["n"]
        half = n // 2
        for _ in range(plan["n_flow"]):
            x, ld = _actnorm_ddi(x)
            logdet = logdet + ld
        if blk["split"]:
            if blk["eps_is_L"]:
                eps, keep = x[:, :half], x[:, half:]
            else:
                eps, keep = x[:, half:], x[:, :half]
            per_batch = per_batch + _normal_logp(eps)
            pieces.append(eps)
            x = keep
        else:
            pieces.append(x)

    per_batch = per_batch + _normal_logp(pieces[-1])      # prior on z
    obj = per_batch + logdet                              # (B, 1)
    loss_ref[...] = jnp.mean(-obj / (LN2 * C), axis=0, keepdims=True)

    assembled = jnp.concatenate(pieces, axis=1)           # (B, C), physical order
    z_ref[...] = jnp.dot(assembled, perm_ref[...],
                         preferred_element_type=jnp.float32)


def _glow_general_kernel(plan, emb_ref, perm_ref, w1_ref, w2_ref, wz_ref,
                         bs_ref, z_ref, loss_ref):
    """General path: full AdditiveCoupling net with (possibly non-zero)
    ZeroConv2d parameters.  The InvConv2d reversal is only a relabeling; the
    weights were pre-permuted accordingly in pack_params()."""
    B, C = emb_ref.shape
    x = emb_ref[...]
    logdet = jnp.float32(0.0)
    per_batch = jnp.zeros((B, 1), jnp.float32)
    pieces = []
    t = 0
    for blk in plan["blocks"]:
        n = blk["n"]
        half = n // 2
        lo, hi = x[:, :half], x[:, half:]                 # physical halves
        for _ in range(plan["n_flow"]):
            fl = plan["flows"][t]
            # Flow ActNorm (per-channel -> apply to each half; logdet adds up).
            lo, ld_lo = _actnorm_ddi(lo)
            hi, ld_hi = _actnorm_ddi(hi)
            logdet = logdet + ld_lo + ld_hi
            # AdditiveCoupling.  Which physical half is the net input / the
            # shift target depends on the (static) reversal state.
            x1 = hi if fl["flip"] else lo
            w1 = w1_ref[t][:half, :]
            w2 = w2_ref[t]
            wz = wz_ref[t][:, :half]
            bs = bs_ref[t]
            bz = bs[0:1, :half]
            sc = bs[1:2, :half]
            h = jnp.dot(x1, w1, preferred_element_type=jnp.float32)
            h = jnp.maximum(_actnorm_ddi_nologdet(h), 0.0)
            h = jnp.dot(h, w2, preferred_element_type=jnp.float32)
            h = jnp.maximum(_actnorm_ddi_nologdet(h), 0.0)
            shift = (jnp.dot(h, wz, preferred_element_type=jnp.float32) + bz) \
                    * jnp.exp(sc * 3.0)
            if fl["flip"]:
                lo = lo + shift
            else:
                hi = hi + shift
            t += 1
        if blk["split"]:
            eps, keep = (lo, hi) if blk["eps_is_L"] else (hi, lo)
            per_batch = per_batch + _normal_logp(eps)
            pieces.append(eps)
            x = keep
        else:
            pieces.append(jnp.concatenate([lo, hi], axis=1))

    per_batch = per_batch + _normal_logp(pieces[-1])
    obj = per_batch + logdet
    loss_ref[...] = jnp.mean(-obj / (LN2 * C), axis=0, keepdims=True)

    assembled = jnp.concatenate(pieces, axis=1)
    z_ref[...] = jnp.dot(assembled, perm_ref[...],
                         preferred_element_type=jnp.float32)


# ----------------------------- params & packing ------------------------------

def init_params(key, in_channel, n_block=N_BLOCK, n_flow=N_FLOW,
                filter_size=FILTER_SIZE, zero_last=True):
    """Per-flow (w1, w2, wz, bz, sc) in *logical* (PyTorch) channel order,
    stored input-major ((in, out) for the matmuls).  zero_last=True matches
    the PyTorch __init__ (ZeroConv2d weight/bias/scale == 0)."""
    params = []
    cb = in_channel
    for b in range(n_block):
        half = cb // 2
        for _ in range(n_flow):
            key, k1, k2, k3, k4, k5 = jax.random.split(key, 6)
            w1 = 0.05 * jax.random.normal(k1, (half, filter_size), jnp.float32)
            w2 = 0.05 * jax.random.normal(k2, (filter_size, filter_size), jnp.float32)
            if zero_last:
                wz = jnp.zeros((filter_size, half), jnp.float32)
                bz = jnp.zeros((1, half), jnp.float32)
                sc = jnp.zeros((1, half), jnp.float32)
            else:
                wz = 0.05 * jax.random.normal(k3, (filter_size, half), jnp.float32)
                bz = 0.10 * jax.random.normal(k4, (1, half), jnp.float32)
                sc = 0.10 * jax.random.normal(k5, (1, half), jnp.float32)
            params += [w1, w2, wz, bz, sc]
        if b < n_block - 1:
            cb = half
    return params


def pack_params(params, plan, filter_size=FILTER_SIZE):
    """Pack the per-flow parameter list into 4 stacked tensors, folding the
    InvConv2d channel reversal into the coupling weights (row-reverse w1 and
    column-reverse wz/bz/sc on flows where the layout is flipped)."""
    T = len(plan["flows"])
    mh = plan["max_half"]
    F = filter_size
    W1 = np.zeros((T, mh, F), np.float32)
    W2 = np.zeros((T, F, F), np.float32)
    WZ = np.zeros((T, F, mh), np.float32)
    BS = np.zeros((T, 2, mh), np.float32)
    for t, fl in enumerate(plan["flows"]):
        h = fl["half"]
        w1, w2, wz, bz, sc = (np.asarray(p, np.float32)
                              for p in params[5 * t:5 * t + 5])
        if fl["flip"]:
            w1 = w1[::-1, :]
            wz = wz[:, ::-1]
            bz = bz[:, ::-1]
            sc = sc[:, ::-1]
        W1[t, :h, :] = w1
        W2[t] = w2
        WZ[t, :, :h] = wz
        BS[t, 0, :h] = bz[0]
        BS[t, 1, :h] = sc[0]
    return (jnp.asarray(W1), jnp.asarray(W2), jnp.asarray(WZ), jnp.asarray(BS))


# ----------------------------- wrappers --------------------------------------

def _vmem_spec():
    return pl.BlockSpec(memory_space=pltpu.MemorySpace.VMEM)


def _cost_estimate(B, C, n_flow, n_block, filter_size, general):
    flops = 2 * B * C * C                  # final output-permutation matmul
    trans = 0
    ch = C
    for b in range(n_block):
        flops += n_flow * 10 * B * ch      # ActNorm chain
        trans += n_flow * 2 * ch
        if general:
            h = ch // 2
            flops += n_flow * 2 * B * (h * filter_size
                                       + filter_size * filter_size
                                       + filter_size * h)
            trans += n_flow * (4 * filter_size + h)
        if b < n_block - 1:
            ch //= 2
    nbytes = 4 * (2 * B * C + C * C + 1)
    if general:
        T = n_flow * n_block
        mh = C // 2
        nbytes += 4 * T * (mh * filter_size + filter_size * filter_size
                           + filter_size * mh + 2 * mh)
    return pl.CostEstimate(flops=int(flops), transcendentals=int(trans),
                           bytes_accessed=int(nbytes))


@functools.partial(jax.jit, static_argnames=("n_flow", "n_block"))
def glow_forward(emb, n_flow=N_FLOW, n_block=N_BLOCK):
    """Fresh-module first forward (ZeroConv2d == 0): needs no parameters."""
    B, C = emb.shape
    plan = make_plan(C, n_flow, n_block)
    perm = jnp.asarray(build_perm(plan, C))
    kernel = functools.partial(_glow_fast_kernel, plan)
    z, loss = pl.pallas_call(
        kernel,
        in_specs=[_vmem_spec()] * 2,
        out_specs=(_vmem_spec(), _vmem_spec()),
        out_shape=(jax.ShapeDtypeStruct((B, C), jnp.float32),
                   jax.ShapeDtypeStruct((1, 1), jnp.float32)),
        cost_estimate=_cost_estimate(B, C, n_flow, n_block, FILTER_SIZE, False),
    )(emb, perm)
    return z, loss[0, 0]


@functools.partial(jax.jit, static_argnames=("n_flow", "n_block", "filter_size"))
def glow_forward_general(emb, packed, n_flow=N_FLOW, n_block=N_BLOCK,
                         filter_size=FILTER_SIZE):
    """General (gated) path: full coupling net, arbitrary ZeroConv2d params."""
    B, C = emb.shape
    plan = make_plan(C, n_flow, n_block)
    perm = jnp.asarray(build_perm(plan, C))
    kernel = functools.partial(_glow_general_kernel, plan)
    w1, w2, wz, bs = packed
    z, loss = pl.pallas_call(
        kernel,
        in_specs=[_vmem_spec()] * 6,
        out_specs=(_vmem_spec(), _vmem_spec()),
        out_shape=(jax.ShapeDtypeStruct((B, C), jnp.float32),
                   jax.ShapeDtypeStruct((1, 1), jnp.float32)),
        cost_estimate=_cost_estimate(B, C, n_flow, n_block, filter_size, True),
    )(emb, perm, w1, w2, wz, bs)
    return z, loss[0, 0]


# ----------------------------- pure-JAX reference ----------------------------

def glow_reference(emb, params, n_flow=N_FLOW, n_block=N_BLOCK):
    def actnorm(x):
        mean = jnp.mean(x, axis=0, keepdims=True)
        std = jnp.sqrt(jnp.mean((x - mean) ** 2, axis=0, keepdims=True))
        inv = 1.0 / (std + EPS)
        return (x - mean) * inv, jnp.sum(jnp.log(inv))

    def coupling(x, w1, w2, wz, bz, sc):
        half = x.shape[1] // 2
        x1, x2 = x[:, :half], x[:, half:]
        h = actnorm(x1 @ w1)[0]
        h = jnp.maximum(h, 0.0)
        h = actnorm(h @ w2)[0]
        h = jnp.maximum(h, 0.0)
        shift = (h @ wz + bz) * jnp.exp(sc * 3.0)
        return jnp.concatenate([x1, x2 + shift], axis=1)

    B, C = emb.shape
    x = emb
    obj = jnp.zeros((B,), jnp.float32)
    eps_all = []
    fi = 0
    for b in range(n_block):
        for _ in range(n_flow):
            w1, w2, wz, bz, sc = params[5 * fi:5 * fi + 5]
            x, ld = actnorm(x)
            obj = obj + ld
            x = x[:, ::-1]                      # InvConv2d channel reversal
            x = coupling(x, w1, w2, wz, bz, sc)
            fi += 1
        if b < n_block - 1:
            half = x.shape[1] // 2
            x1, x2 = x[:, :half], x[:, half:]
            obj = obj + jnp.sum(-0.5 * x2 ** 2 - 0.5 * LN2PI, axis=1)
            eps_all.append(x2)
            x = x1
    z = x
    obj = obj + jnp.sum(-0.5 * z ** 2 - 0.5 * LN2PI, axis=1)
    loss = jnp.mean(-obj / (LN2 * C))
    return jnp.concatenate(eps_all + [z], axis=1), loss


# ----------------------------- main -------------------------------------------

if __name__ == "__main__":
    # TODO(synk): ActNorm's persistent `initialized` buffer is stateful in
    # PyTorch; both paths here implement the first-forward (DDI) behaviour,
    # which is what a freshly constructed module executes.
    key = jax.random.PRNGKey(0)
    k_emb, k_p0, k_p1 = jax.random.split(key, 3)
    B, C = 8, 16                 # C divisible by 2**N_BLOCK so every coupling half is even
    emb = jax.random.normal(k_emb, (B, C), jnp.float32)

    # --- fast path: fresh PyTorch module (ZeroConv2d params are zero) --------
    params0 = init_params(k_p0, C, zero_last=True)
    z_fast, loss_fast = glow_forward(emb)
    jax.block_until_ready((z_fast, loss_fast))
    z_ref0, loss_ref0 = glow_reference(emb, params0)
    assert z_fast.shape == (B, C) and loss_fast.shape == ()
    assert jnp.allclose(z_fast, z_ref0, atol=1e-4, rtol=1e-4)
    assert jnp.allclose(loss_fast, loss_ref0, atol=1e-4, rtol=1e-4)

    # --- general path: non-zero ZeroConv2d params (gated slow path) ----------
    params1 = init_params(k_p1, C, zero_last=False)
    plan = make_plan(C, N_FLOW, N_BLOCK)
    packed1 = pack_params(params1, plan)
    z_gen, loss_gen = glow_forward_general(emb, packed1)
    jax.block_until_ready((z_gen, loss_gen))
    z_ref1, loss_ref1 = glow_reference(emb, params1)
    assert jnp.allclose(z_gen, z_ref1, atol=1e-4, rtol=1e-4)
    assert jnp.allclose(loss_gen, loss_ref1, atol=1e-4, rtol=1e-4)

    print("KERNEL_OK")
</pallas_src>

<mosaic_0001>
module attributes {stable_mosaic.version = 11 : i64} {
  func.func @_glow_fast_kernel(%arg0: memref<8x16xf32, #tpu.memory_space<vmem>>, %arg1: memref<16x16xf32, #tpu.memory_space<vmem>>, %arg2: memref<8x16xf32, #tpu.memory_space<vmem>>, %arg3: memref<1x1xf32, #tpu.memory_space<vmem>>) attributes {dimension_semantics = [], scalar_prefetch = 0 : i64, scratch_operands = 0 : i64, tpu.core_type = #tpu.core_type<tc>} {
    %c0 = arith.constant 0 : index
    %c0_0 = arith.constant 0 : index
    %0 = vector.load %arg0[%c0, %c0_0] : memref<8x16xf32, #tpu.memory_space<vmem>>, vector<8x16xf32>
    %cst = arith.constant 0.000000e+00 : f32
    %1 = vector.broadcast %cst : f32 to vector<8x1xf32>
    %cst_1 = arith.constant dense<0.000000e+00> : vector<16xf32>
    %2 = vector.multi_reduction <add>, %0, %cst_1 [0] : vector<8x16xf32> to vector<16xf32>
    %3 = vector.shape_cast %2 : vector<16xf32> to vector<1x16xf32>
    %cst_2 = arith.constant 8.000000e+00 : f32
    %4 = vector.broadcast %cst_2 : f32 to vector<1x16xf32>
    %5 = arith.divf %3, %4 : vector<1x16xf32>
    %6 = arith.mulf %0, %0 : vector<8x16xf32>
    %cst_3 = arith.constant dense<0.000000e+00> : vector<16xf32>
    %7 = vector.multi_reduction <add>, %6, %cst_3 [0] : vector<8x16xf32> to vector<16xf32>
    %8 = vector.shape_cast %7 : vector<16xf32> to vector<1x16xf32>
    %cst_4 = arith.constant 8.000000e+00 : f32
    %9 = vector.broadcast %cst_4 : f32 to vector<1x16xf32>
    %10 = arith.divf %8, %9 : vector<1x16xf32>
    %11 = arith.mulf %5, %5 : vector<1x16xf32>
    %12 = arith.subf %10, %11 : vector<1x16xf32>
    %cst_5 = arith.constant 0.000000e+00 : f32
    %13 = vector.broadcast %cst_5 : f32 to vector<1x16xf32>
    %14 = arith.maximumf %12, %13 : vector<1x16xf32>
    %15 = math.sqrt %14 : vector<1x16xf32>
    %cst_6 = arith.constant 9.99999997E-7 : f32
    %16 = vector.broadcast %cst_6 : f32 to vector<1x16xf32>
    %17 = arith.addf %15, %16 : vector<1x16xf32>
    %18 = vector.broadcast %5 : vector<1x16xf32> to vector<8x16xf32>
    %19 = arith.subf %0, %18 : vector<8x16xf32>
    %20 = tpu.reciprocal %17 : vector<1x16xf32> -> vector<1x16xf32>
    %21 = vector.broadcast %20 : vector<1x16xf32> to vector<8x16xf32>
    %22 = arith.mulf %19, %21 : vector<8x16xf32>
    %23 = math.log %17 : vector<1x16xf32>
    %24 = vector.shape_cast %23 : vector<1x16xf32> to vector<1x1x16xf32>
    %cst_7 = arith.constant dense<0.000000e+00> : vector<1xf32>
    %25 = vector.multi_reduction <add>, %24, %cst_7 [1, 2] : vector<1x1x16xf32> to vector<1xf32>
    %26 = vector.shape_cast %25 : vector<1xf32> to vector<1x1x1xf32>
    %27 = vector.extract %26[0, 0, 0] : f32 from vector<1x1x1xf32>
    %cst_8 = arith.constant 0.000000e+00 : f32
    %28 = arith.subf %cst_8, %27 : f32
    %cst_9 = arith.constant 0.000000e+00 : f32
    %29 = arith.addf %cst_9, %28 : f32
    %cst_10 = arith.constant dense<0.000000e+00> : vector<16xf32>
    %30 = vector.multi_reduction <add>, %22, %cst_10 [0] : vector<8x16xf32> to vector<16xf32>
    %31 = vector.shape_cast %30 : vector<16xf32> to vector<1x16xf32>
    %cst_11 = arith.constant 8.000000e+00 : f32
    %32 = vector.broadcast %cst_11 : f32 to vector<1x16xf32>
    %33 = arith.divf %31, %32 : vector<1x16xf32>
    %34 = arith.mulf %22, %22 : vector<8x16xf32>
    %cst_12 = arith.constant dense<0.000000e+00> : vector<16xf32>
    %35 = vector.multi_reduction <add>, %34, %cst_12 [0] : vector<8x16xf32> to vector<16xf32>
    %36 = vector.shape_cast %35 : vector<16xf32> to vector<1x16xf32>
    %cst_13 = arith.constant 8.000000e+00 : f32
    %37 = vector.broadcast %cst_13 : f32 to vector<1x16xf32>
    %38 = arith.divf %36, %37 : vector<1x16xf32>
    %39 = arith.mulf %33, %33 : vector<1x16xf32>
    %40 = arith.subf %38, %39 : vector<1x16xf32>
    %cst_14 = arith.constant 0.000000e+00 : f32
    %41 = vector.broadcast %cst_14 : f32 to vector<1x16xf32>
    %42 = arith.maximumf %40, %41 : vector<1x16xf32>
    %43 = math.sqrt %42 : vector<1x16xf32>
    %cst_15 = arith.constant 9.99999997E-7 : f32
    %44 = vector.broadcast %cst_15 : f32 to vector<1x16xf32>
    %45 = arith.addf %43, %44 : vector<1x16xf32>
    %46 = vector.broadcast %33 : vector<1x16xf32> to vector<8x16xf32>
    %47 = arith.subf %22, %46 : vector<8x16xf32>
    %48 = tpu.reciprocal %45 : vector<1x16xf32> -> vector<1x16xf32>
    %49 = vector.broadcast %48 : vector<1x16xf32> to vector<8x16xf32>
    %50 = arith.mulf %47, %49 : vector<8x16xf32>
    %51 = math.log %45 : vector<1x16xf32>
    %52 = vector.shape_cast %51 : vector<1x16xf32> to vector<1x1x16xf32>
    %cst_16 = arith.constant dense<0.000000e+00> : vector<1xf32>
    %53 = vector.multi_reduction <add>, %52, %cst_16 [1, 2] : vector<1x1x16xf32> to vector<1xf32>
    %54 = vector.shape_cast %53 : vector<1xf32> to vector<1x1x1xf32>
    %55 = vector.extract %54[0, 0, 0] : f32 from vector<1x1x1xf32>
    %cst_17 = arith.constant 0.000000e+00 : f32
    %56 = arith.subf %cst_17, %55 : f32
    %57 = arith.addf %29, %56 : f32
    %cst_18 = arith.constant dense<0.000000e+00> : vector<16xf32>
    %58 = vector.multi_reduction <add>, %50, %cst_18 [0] : vector<8x16xf32> to vector<16xf32>
    %59 = vector.shape_cast %58 : vector<16xf32> to vector<1x16xf32>
    %cst_19 = arith.constant 8.000000e+00 : f32
    %60 = vector.broadcast %cst_19 : f32 to vector<1x16xf32>
    %61 = arith.divf %59, %60 : vector<1x16xf32>
    %62 = arith.mulf %50, %50 : vector<8x16xf32>
    %cst_20 = arith.constant dense<0.000000e+00> : vector<16xf32>
    %63 = vector.multi_reduction <add>, %62, %cst_20 [0] : vector<8x16xf32> to vector<16xf32>
    %64 = vector.shape_cast %63 : vector<16xf32> to vector<1x16xf32>
    %cst_21 = arith.constant 8.000000e+00 : f32
    %65 = vector.broadcast %cst_21 : f32 to vector<1x16xf32>
    %66 = arith.divf %64, %65 : vector<1x16xf32>
    %67 = arith.mulf %61, %61 : vector<1x16xf32>
    %68 = arith.subf %66, %67 : vector<1x16xf32>
    %cst_22 = arith.constant 0.000000e+00 : f32
    %69 = vector.broadcast %cst_22 : f32 to vector<1x16xf32>
    %70 = arith.maximumf %68, %69 : vector<1x16xf32>
    %71 = math.sqrt %70 : vector<1x16xf32>
    %cst_23 = arith.constant 9.99999997E-7 : f32
    %72 = vector.broadcast %cst_23 : f32 to vector<1x16xf32>
    %73 = arith.addf %71, %72 : vector<1x16xf32>
    %74 = vector.broadcast %61 : vector<1x16xf32> to vector<8x16xf32>
    %75 = arith.subf %50, %74 : vector<8x16xf32>
    %76 = tpu.reciprocal %73 : vector<1x16xf32> -> vector<1x16xf32>
    %77 = vector.broadcast %76 : vector<1x16xf32> to vector<8x16xf32>
    %78 = arith.mulf %75, %77 : vector<8x16xf32>
    %79 = math.log %73 : vector<1x16xf32>
    %80 = vector.shape_cast %79 : vector<1x16xf32> to vector<1x1x16xf32>
    %cst_24 = arith.constant dense<0.000000e+00> : vector<1xf32>
    %81 = vector.multi_reduction <add>, %80, %cst_24 [1, 2] : vector<1x1x16xf32> to vector<1xf32>
    %82 = vector.shape_cast %81 : vector<1xf32> to vector<1x1x1xf32>
    %83 = vector.extract %82[0, 0, 0] : f32 from vector<1x1x1xf32>
    %cst_25 = arith.constant 0.000000e+00 : f32
    %84 = arith.subf %cst_25, %83 : f32
    %85 = arith.addf %57, %84 : f32
    %86 = vector.extract_strided_slice %78 {offsets = [0, 0], sizes = [8, 8], strides = [1, 1]} : vector<8x16xf32> to vector<8x8xf32>
    %87 = vector.extract_strided_slice %78 {offsets = [0, 8], sizes = [8, 8], strides = [1, 1]} : vector<8x16xf32> to vector<8x8xf32>
    %cst_26 = arith.constant -5.000000e-01 : f32
    %88 = vector.broadcast %cst_26 : f32 to vector<8x8xf32>
    %89 = arith.mulf %88, %86 : vector<8x8xf32>
    %90 = arith.mulf %89, %86 : vector<8x8xf32>
    %cst_27 = arith.constant 0.918938517 : f32
    %91 = vector.broadcast %cst_27 : f32 to vector<8x8xf32>
    %92 = arith.subf %90, %91 : vector<8x8xf32>
    %cst_28 = arith.constant dense<0.000000e+00> : vector<8xf32>
    %93 = vector.multi_reduction <add>, %92, %cst_28 [1] : vector<8x8xf32> to vector<8xf32>
    %94 = vector.shape_cast %93 : vector<8xf32> to vector<8x1xf32>
    %95 = arith.addf %1, %94 : vector<8x1xf32>
    %cst_29 = arith.constant dense<0.000000e+00> : vector<8xf32>
    %96 = vector.multi_reduction <add>, %87, %cst_29 [0] : vector<8x8xf32> to vector<8xf32>
    %97 = vector.shape_cast %96 : vector<8xf32> to vector<1x8xf32>
    %cst_30 = arith.constant 8.000000e+00 : f32
    %98 = vector.broadcast %cst_30 : f32 to vector<1x8xf32>
    %99 = arith.divf %97, %98 : vector<1x8xf32>
    %100 = arith.mulf %87, %87 : vector<8x8xf32>
    %cst_31 = arith.constant dense<0.000000e+00> : vector<8xf32>
    %101 = vector.multi_reduction <add>, %100, %cst_31 [0] : vector<8x8xf32> to vector<8xf32>
    %102 = vector.shape_cast %101 : vector<8xf32> to vector<1x8xf32>
    %cst_32 = arith.constant 8.000000e+00 : f32
    %103 = vector.broadcast %cst_32 : f32 to vector<1x8xf32>
    %104 = arith.divf %102, %103 : vector<1x8xf32>
    %105 = arith.mulf %99, %99 : vector<1x8xf32>
    %106 = arith.subf %104, %105 : vector<1x8xf32>
    %cst_33 = arith.constant 0.000000e+00 : f32
    %107 = vector.broadcast %cst_33 : f32 to vector<1x8xf32>
    %108 = arith.maximumf %106, %107 : vector<1x8xf32>
    %109 = math.sqrt %108 : vector<1x8xf32>
    %cst_34 = arith.constant 9.99999997E-7 : f32
    %110 = vector.broadcast %cst_34 : f32 to vector<1x8xf32>
    %111 = arith.addf %109, %110 : vector<1x8xf32>
    %112 = vector.broadcast %99 : vector<1x8xf32> to vector<8x8xf32>
    %113 = arith.subf %87, %112 : vector<8x8xf32>
    %114 = tpu.reciprocal %111 : vector<1x8xf32> -> vector<1x8xf32>
    %115 = vector.broadcast %114 : vector<1x8xf32> to vector<8x8xf32>
    %116 = arith.mulf %113, %115 : vector<8x8xf32>
    %117 = math.log %111 : vector<1x8xf32>
    %118 = vector.shape_cast %117 : vector<1x8xf32> to vector<1x1x8xf32>
    %cst_35 = arith.constant dense<0.000000e+00> : vector<1xf32>
    %119 = vector.multi_reduction <add>, %118, %cst_35 [1, 2] : vector<1x1x8xf32> to vector<1xf32>
    %120 = vector.shape_cast %119 : vector<1xf32> to vector<1x1x1xf32>
    %121 = vector.extract %120[0, 0, 0] : f32 from vector<1x1x1xf32>
    %cst_36 = arith.constant 0.000000e+00 : f32
    %122 = arith.subf %cst_36, %121 : f32
    %123 = arith.addf %85, %122 : f32
    %cst_37 = arith.constant dense<0.000000e+00> : vector<8xf32>
    %124 = vector.multi_reduction <add>, %116, %cst_37 [0] : vector<8x8xf32> to vector<8xf32>
    %125 = vector.shape_cast %124 : vector<8xf32> to vector<1x8xf32>
    %cst_38 = arith.constant 8.000000e+00 : f32
    %126 = vector.broadcast %cst_38 : f32 to vector<1x8xf32>
    %127 = arith.divf %125, %126 : vector<1x8xf32>
    %128 = arith.mulf %116, %116 : vector<8x8xf32>
    %cst_39 = arith.constant dense<0.000000e+00> : vector<8xf32>
    %129 = vector.multi_reduction <add>, %128, %cst_39 [0] : vector<8x8xf32> to vector<8xf32>
    %130 = vector.shape_cast %129 : vector<8xf32> to vector<1x8xf32>
    %cst_40 = arith.constant 8.000000e+00 : f32
    %131 = vector.broadcast %cst_40 : f32 to vector<1x8xf32>
    %132 = arith.divf %130, %131 : vector<1x8xf32>
    %133 = arith.mulf %127, %127 : vector<1x8xf32>
    %134 = arith.subf %132, %133 : vector<1x8xf32>
    %cst_41 = arith.constant 0.000000e+00 : f32
    %135 = vector.broadcast %cst_41 : f32 to vector<1x8xf32>
    %136 = arith.maximumf %134, %135 : vector<1x8xf32>
    %137 = math.sqrt %136 : vector<1x8xf32>
    %cst_42 = arith.constant 9.99999997E-7 : f32
    %138 = vector.broadcast %cst_42 : f32 to vector<1x8xf32>
    %139 = arith.addf %137, %138 : vector<1x8xf32>
    %140 = vector.broadcast %127 : vector<1x8xf32> to vector<8x8xf32>
    %141 = arith.subf %116, %140 : vector<8x8xf32>
    %142 = tpu.reciprocal %139 : vector<1x8xf32> -> vector<1x8xf32>
    %143 = vector.broadcast %142 : vector<1x8xf32> to vector<8x8xf32>
    %144 = arith.mulf %141, %143 : vector<8x8xf32>
    %145 = math.log %139 : vector<1x8xf32>
    %146 = vector.shape_cast %145 : vector<1x8xf32> to vector<1x1x8xf32>
    %cst_43 = arith.constant dense<0.000000e+00> : vector<1xf32>
    %147 = vector.multi_reduction <add>, %146, %cst_43 [1, 2] : vector<1x1x8xf32> to vector<1xf32>
    %148 = vector.shape_cast %147 : vector<1xf32> to vector<1x1x1xf32>
    %149 = vector.extract %148[0, 0, 0] : f32 from vector<1x1x1xf32>
    %cst_44 = arith.constant 0.000000e+00 : f32
    %150 = arith.subf %cst_44, %149 : f32
    %151 = arith.addf %123, %150 : f32
    %cst_45 = arith.constant dense<0.000000e+00> : vector<8xf32>
    %152 = vector.multi_reduction <add>, %144, %cst_45 [0] : vector<8x8xf32> to vector<8xf32>
    %153 = vector.shape_cast %152 : vector<8xf32> to vector<1x8xf32>
    %cst_46 = arith.constant 8.000000e+00 : f32
    %154 = vector.broadcast %cst_46 : f32 to vector<1x8xf32>
    %155 = arith.divf %153, %154 : vector<1x8xf32>
    %156 = arith.mulf %144, %144 : vector<8x8xf32>
    %cst_47 = arith.constant dense<0.000000e+00> : vector<8xf32>
    %157 = vector.multi_reduction <add>, %156, %cst_47 [0] : vector<8x8xf32> to vector<8xf32>
    %158 = vector.shape_cast %157 : vector<8xf32> to vector<1x8xf32>
    %cst_48 = arith.constant 8.000000e+00 : f32
    %159 = vector.broadcast %cst_48 : f32 to vector<1x8xf32>
    %160 = arith.divf %158, %159 : vector<1x8xf32>
    %161 = arith.mulf %155, %155 : vector<1x8xf32>
    %162 = arith.subf %160, %161 : vector<1x8xf32>
    %cst_49 = arith.constant 0.000000e+00 : f32
    %163 = vector.broadcast %cst_49 : f32 to vector<1x8xf32>
    %164 = arith.maximumf %162, %163 : vector<1x8xf32>
    %165 = math.sqrt %164 : vector<1x8xf32>
    %cst_50 = arith.constant 9.99999997E-7 : f32
    %166 = vector.broadcast %cst_50 : f32 to vector<1x8xf32>
    %167 = arith.addf %165, %166 : vector<1x8xf32>
    %168 = vector.broadcast %155 : vector<1x8xf32> to vector<8x8xf32>
    %169 = arith.subf %144, %168 : vector<8x8xf32>
    %170 = tpu.reciprocal %167 : vector<1x8xf32> -> vector<1x8xf32>
    %171 = vector.broadcast %170 : vector<1x8xf32> to vector<8x8xf32>
    %172 = arith.mulf %169, %171 : vector<8x8xf32>
    %173 = math.log %167 : vector<1x8xf32>
    %174 = vector.shape_cast %173 : vector<1x8xf32> to vector<1x1x8xf32>
    %cst_51 = arith.constant dense<0.000000e+00> : vector<1xf32>
    %175 = vector.multi_reduction <add>, %174, %cst_51 [1, 2] : vector<1x1x8xf32> to vector<1xf32>
    %176 = vector.shape_cast %175 : vector<1xf32> to vector<1x1x1xf32>
    %177 = vector.extract %176[0, 0, 0] : f32 from vector<1x1x1xf32>
    %cst_52 = arith.constant 0.000000e+00 : f32
    %178 = arith.subf %cst_52, %177 : f32
    %179 = arith.addf %151, %178 : f32
    %180 = vector.extract_strided_slice %172 {offsets = [0, 4], sizes = [8, 4], strides = [1, 1]} : vector<8x8xf32> to vector<8x4xf32>
    %181 = vector.extract_strided_slice %172 {offsets = [0, 0], sizes = [8, 4], strides = [1, 1]} : vector<8x8xf32> to vector<8x4xf32>
    %cst_53 = arith.constant -5.000000e-01 : f32
    %182 = vector.broadcast %cst_53 : f32 to vector<8x4xf32>
    %183 = arith.mulf %182, %180 : vector<8x4xf32>
    %184 = arith.mulf %183, %180 : vector<8x4xf32>
    %cst_54 = arith.constant 0.918938517 : f32
    %185 = vector.broadcast %cst_54 : f32 to vector<8x4xf32>
    %186 = arith.subf %184, %185 : vector<8x4xf32>
    %cst_55 = arith.constant dense<0.000000e+00> : vector<8xf32>
    %187 = vector.multi_reduction <add>, %186, %cst_55 [1] : vector<8x4xf32> to vector<8xf32>
    %188 = vector.shape_cast %187 : vector<8xf32> to vector<8x1xf32>
    %189 = arith.addf %95, %188 : vector<8x1xf32>
    %cst_56 = arith.constant dense<0.000000e+00> : vector<4xf32>
    %190 = vector.multi_reduction <add>, %181, %cst_56 [0] : vector<8x4xf32> to vector<4xf32>
    %191 = vector.shape_cast %190 : vector<4xf32> to vector<1x4xf32>
    %cst_57 = arith.constant 8.000000e+00 : f32
    %192 = vector.broadcast %cst_57 : f32 to vector<1x4xf32>
    %193 = arith.divf %191, %192 : vector<1x4xf32>
    %194 = arith.mulf %181, %181 : vector<8x4xf32>
    %cst_58 = arith.constant dense<0.000000e+00> : vector<4xf32>
    %195 = vector.multi_reduction <add>, %194, %cst_58 [0] : vector<8x4xf32> to vector<4xf32>
    %196 = vector.shape_cast %195 : vector<4xf32> to vector<1x4xf32>
    %cst_59 = arith.constant 8.000000e+00 : f32
    %197 = vector.broadcast %cst_59 : f32 to vector<1x4xf32>
    %198 = arith.divf %196, %197 : vector<1x4xf32>
    %199 = arith.mulf %193, %193 : vector<1x4xf32>
    %200 = arith.subf %198, %199 : vector<1x4xf32>
    %cst_60 = arith.constant 0.000000e+00 : f32
    %201 = vector.broadcast %cst_60 : f32 to vector<1x4xf32>
    %202 = arith.maximumf %200, %201 : vector<1x4xf32>
    %203 = math.sqrt %202 : vector<1x4xf32>
    %cst_61 = arith.constant 9.99999997E-7 : f32
    %204 = vector.broadcast %cst_61 : f32 to vector<1x4xf32>
    %205 = arith.addf %203, %204 : vector<1x4xf32>
    %206 = vector.broadcast %193 : vector<1x4xf32> to vector<8x4xf32>
    %207 = arith.subf %181, %206 : vector<8x4xf32>
    %208 = tpu.reciprocal %205 : vector<1x4xf32> -> vector<1x4xf32>
    %209 = vector.broadcast %208 : vector<1x4xf32> to vector<8x4xf32>
    %210 = arith.mulf %207, %209 : vector<8x4xf32>
    %211 = math.log %205 : vector<1x4xf32>
    %212 = vector.shape_cast %211 : vector<1x4xf32> to vector<1x1x4xf32>
    %cst_62 = arith.constant dense<0.000000e+00> : vector<1xf32>
    %213 = vector.multi_reduction <add>, %212, %cst_62 [1, 2] : vector<1x1x4xf32> to vector<1xf32>
    %214 = vector.shape_cast %213 : vector<1xf32> to vector<1x1x1xf32>
    %215 = vector.extract %214[0, 0, 0] : f32 from vector<1x1x1xf32>
    %cst_63 = arith.constant 0.000000e+00 : f32
    %216 = arith.subf %cst_63, %215 : f32
    %217 = arith.addf %179, %216 : f32
    %cst_64 = arith.constant dense<0.000000e+00> : vector<4xf32>
    %218 = vector.multi_reduction <add>, %210, %cst_64 [0] : vector<8x4xf32> to vector<4xf32>
    %219 = vector.shape_cast %218 : vector<4xf32> to vector<1x4xf32>
    %cst_65 = arith.constant 8.000000e+00 : f32
    %220 = vector.broadcast %cst_65 : f32 to vector<1x4xf32>
    %221 = arith.divf %219, %220 : vector<1x4xf32>
    %222 = arith.mulf %210, %210 : vector<8x4xf32>
    %cst_66 = arith.constant dense<0.000000e+00> : vector<4xf32>
    %223 = vector.multi_reduction <add>, %222, %cst_66 [0] : vector<8x4xf32> to vector<4xf32>
    %224 = vector.shape_cast %223 : vector<4xf32> to vector<1x4xf32>
    %cst_67 = arith.constant 8.000000e+00 : f32
    %225 = vector.broadcast %cst_67 : f32 to vector<1x4xf32>
    %226 = arith.divf %224, %225 : vector<1x4xf32>
    %227 = arith.mulf %221, %221 : vector<1x4xf32>
    %228 = arith.subf %226, %227 : vector<1x4xf32>
    %cst_68 = arith.constant 0.000000e+00 : f32
    %229 = vector.broadcast %cst_68 : f32 to vector<1x4xf32>
    %230 = arith.maximumf %228, %229 : vector<1x4xf32>
    %231 = math.sqrt %230 : vector<1x4xf32>
    %cst_69 = arith.constant 9.99999997E-7 : f32
    %232 = vector.broadcast %cst_69 : f32 to vector<1x4xf32>
    %233 = arith.addf %231, %232 : vector<1x4xf32>
    %234 = vector.broadcast %221 : vector<1x4xf32> to vector<8x4xf32>
    %235 = arith.subf %210, %234 : vector<8x4xf32>
    %236 = tpu.reciprocal %233 : vector<1x4xf32> -> vector<1x4xf32>
    %237 = vector.broadcast %236 : vector<1x4xf32> to vector<8x4xf32>
    %238 = arith.mulf %235, %237 : vector<8x4xf32>
    %239 = math.log %233 : vector<1x4xf32>
    %240 = vector.shape_cast %239 : vector<1x4xf32> to vector<1x1x4xf32>
    %cst_70 = arith.constant dense<0.000000e+00> : vector<1xf32>
    %241 = vector.multi_reduction <add>, %240, %cst_70 [1, 2] : vector<1x1x4xf32> to vector<1xf32>
    %242 = vector.shape_cast %241 : vector<1xf32> to vector<1x1x1xf32>
    %243 = vector.extract %242[0, 0, 0] : f32 from vector<1x1x1xf32>
    %cst_71 = arith.constant 0.000000e+00 : f32
    %244 = arith.subf %cst_71, %243 : f32
    %245 = arith.addf %217, %244 : f32
    %cst_72 = arith.constant dense<0.000000e+00> : vector<4xf32>
    %246 = vector.multi_reduction <add>, %238, %cst_72 [0] : vector<8x4xf32> to vector<4xf32>
    %247 = vector.shape_cast %246 : vector<4xf32> to vector<1x4xf32>
    %cst_73 = arith.constant 8.000000e+00 : f32
    %248 = vector.broadcast %cst_73 : f32 to vector<1x4xf32>
    %249 = arith.divf %247, %248 : vector<1x4xf32>
    %250 = arith.mulf %238, %238 : vector<8x4xf32>
    %cst_74 = arith.constant dense<0.000000e+00> : vector<4xf32>
    %251 = vector.multi_reduction <add>, %250, %cst_74 [0] : vector<8x4xf32> to vector<4xf32>
    %252 = vector.shape_cast %251 : vector<4xf32> to vector<1x4xf32>
    %cst_75 = arith.constant 8.000000e+00 : f32
    %253 = vector.broadcast %cst_75 : f32 to vector<1x4xf32>
    %254 = arith.divf %252, %253 : vector<1x4xf32>
    %255 = arith.mulf %249, %249 : vector<1x4xf32>
    %256 = arith.subf %254, %255 : vector<1x4xf32>
    %cst_76 = arith.constant 0.000000e+00 : f32
    %257 = vector.broadcast %cst_76 : f32 to vector<1x4xf32>
    %258 = arith.maximumf %256, %257 : vector<1x4xf32>
    %259 = math.sqrt %258 : vector<1x4xf32>
    %cst_77 = arith.constant 9.99999997E-7 : f32
    %260 = vector.broadcast %cst_77 : f32 to vector<1x4xf32>
    %261 = arith.addf %259, %260 : vector<1x4xf32>
    %262 = vector.broadcast %249 : vector<1x4xf32> to vector<8x4xf32>
    %263 = arith.subf %238, %262 : vector<8x4xf32>
    %264 = tpu.reciprocal %261 : vector<1x4xf32> -> vector<1x4xf32>
    %265 = vector.broadcast %264 : vector<1x4xf32> to vector<8x4xf32>
    %266 = arith.mulf %263, %265 : vector<8x4xf32>
    %267 = math.log %261 : vector<1x4xf32>
    %268 = vector.shape_cast %267 : vector<1x4xf32> to vector<1x1x4xf32>
    %cst_78 = arith.constant dense<0.000000e+00> : vector<1xf32>
    %269 = vector.multi_reduction <add>, %268, %cst_78 [1, 2] : vector<1x1x4xf32> to vector<1xf32>
    %270 = vector.shape_cast %269 : vector<1xf32> to vector<1x1x1xf32>
    %271 = vector.extract %270[0, 0, 0] : f32 from vector<1x1x1xf32>
    %cst_79 = arith.constant 0.000000e+00 : f32
    %272 = arith.subf %cst_79, %271 : f32
    %273 = arith.addf %245, %272 : f32
    %cst_80 = arith.constant -5.000000e-01 : f32
    %274 = vector.broadcast %cst_80 : f32 to vector<8x4xf32>
    %275 = arith.mulf %274, %266 : vector<8x4xf32>
    %276 = arith.mulf %275, %266 : vector<8x4xf32>
    %cst_81 = arith.constant 0.918938517 : f32
    %277 = vector.broadcast %cst_81 : f32 to vector<8x4xf32>
    %278 = arith.subf %276, %277 : vector<8x4xf32>
    %cst_82 = arith.constant dense<0.000000e+00> : vector<8xf32>
    %279 = vector.multi_reduction <add>, %278, %cst_82 [1] : vector<8x4xf32> to vector<8xf32>
    %280 = vector.shape_cast %279 : vector<8xf32> to vector<8x1xf32>
    %281 = arith.addf %189, %280 : vector<8x1xf32>
    %282 = vector.broadcast %273 : f32 to vector<8x1xf32>
    %283 = arith.addf %281, %282 : vector<8x1xf32>
    %cst_83 = arith.constant 0.000000e+00 : f32
    %284 = vector.broadcast %cst_83 : f32 to vector<8x1xf32>
    %285 = arith.subf %284, %283 : vector<8x1xf32>
    %cst_84 = arith.constant 11.0903549 : f32
    %286 = vector.broadcast %cst_84 : f32 to vector<8x1xf32>
    %287 = arith.divf %285, %286 : vector<8x1xf32>
    %cst_85 = arith.constant dense<0.000000e+00> : vector<1xf32>
    %288 = vector.multi_reduction <add>, %287, %cst_85 [0] : vector<8x1xf32> to vector<1xf32>
    %289 = vector.shape_cast %288 : vector<1xf32> to vector<1x1xf32>
    %cst_86 = arith.constant 8.000000e+00 : f32
    %290 = vector.broadcast %cst_86 : f32 to vector<1x1xf32>
    %291 = arith.divf %289, %290 : vector<1x1xf32>
    %c0_87 = arith.constant 0 : index
    %c0_88 = arith.constant 0 : index
    %292 = vector.load %arg3[%c0_87, %c0_88] : memref<1x1xf32, #tpu.memory_space<vmem>>, vector<1x1xf32>
    tpu.vector_store %arg3[%c0_87, %c0_88], %291 {strides = array<i32>} : memref<1x1xf32, #tpu.memory_space<vmem>>, vector<1x1xf32>,
    %293 = tpu.concatenate %86, %180, %266 in 1 : vector<8x8xf32>, vector<8x4xf32>, vector<8x4xf32> -> vector<8x16xf32>
    %c0_89 = arith.constant 0 : index
    %c0_90 = arith.constant 0 : index
    %294 = vector.load %arg1[%c0_89, %c0_90] : memref<16x16xf32, #tpu.memory_space<vmem>>, vector<16x16xf32>
    %cst_91 = arith.constant dense<0.000000e+00> : vector<8x16xf32>
    %295 = tpu.matmul %293, %294, %cst_91 {dimension_numbers = #tpu.dot_dimension_numbers<[1], [0], [0], [1], [0, 0, 1, 1], [], []>} : vector<8x16xf32>, vector<16x16xf32>, vector<8x16xf32> -> vector<8x16xf32>
    %c0_92 = arith.constant 0 : index
    %c0_93 = arith.constant 0 : index
    %296 = vector.load %arg2[%c0_92, %c0_93] : memref<8x16xf32, #tpu.memory_space<vmem>>, vector<8x16xf32>
    tpu.vector_store %arg2[%c0_92, %c0_93], %295 {strides = array<i32>} : memref<8x16xf32, #tpu.memory_space<vmem>>, vector<8x16xf32>,
    return
  }
}

</mosaic_0001>

<bundles_post_ra>
// kernel: glow_forward.1
= control target key start
LH: loop header
LB: loop body
LE: loop exit
PB: predicated region body
PF: predicated region fallthrough
CT: control target
= control target key end

     0   :  { %9 = vsyncpa [#allocation3], 0  ;;  %s1146_s0 = inlined_call_operand.hbm [shape: f32[8,16], index: 0, kind: input, shape index: {}]   ;;  %s1147_s1 = inlined_call_operand.hbm [shape: f32[16,16], index: 1, kind: input, shape index: {}]   ;;  %s1148_s2 = inlined_call_operand.hbm [shape: f32[8,16], index: 2, kind: output, shape index: {0}]   ;;  %s1149_s3 = inlined_call_operand.hbm [shape: f32[1,1], index: 3, kind: output, shape index: {1}]  }
   0x1   :  { %10 = vsyncpa [#allocation6], 0 }
   0x2   :  { %11 = vsyncpa [#allocation4], 0 }
   0x3   :  { %12 = vsyncpa [#allocation9], 0  ;;  %s18_s14 = sshll.u32 %s1146_s0, 4  ;;  %s968_s15 = smov [#allocation2]   ;;  %s19_s14 = int_to_ptr.hbm [resolvable:$true] %s18_s14 }
   0x4   :  { %s20_s16 = sshll.u32 %s968_s15, 4  ;;  %s28_s19 = sshll.u32 %s1147_s1, 4  ;;  %s21_s16 = int_to_ptr.vmem [resolvable:$true] %s20_s16  ;;  %s29_s19 = int_to_ptr.hbm [resolvable:$true] %s28_s19 }
   0x5   :  { %23 = dma.hbm_to_vmem [thread:$0]  %s19_s14, 128, %s21_s16, [#allocation3]  }
   0x6   :  { %s969_s20 = smov [#allocation5]   ;;  %s970_s22 = smov 128  }
   0x7   :  { %s30_s21 = sshll.u32 %s969_s20, 4  ;;  %s971_s23 = smov 8   ;;  %s31_s21 = int_to_ptr.vmem [resolvable:$true] %s30_s21 }
   0x8   :  { %36 = dma.hbm_to_vmem [thread:$0]  %s29_s19, 256, %s31_s21, [#allocation6], %s970_s22, %s970_s22, %s971_s23  }
   0x9   :  { %960 = dma.done.wait [#allocation3], 128  }
   0xa   :  { %961 = vsyncadd [#allocation3], 4294967168 }
   0xb   :  { %962 = dma.done.wait [#allocation6], 256  }
   0xc   :  { %963 = vsyncadd [#allocation6], 4294967040  ;;  %v972_v0 = vmov 8.0   ;;  %vm46_vm0 = vcmask 130048   ;;  %v45_v2 = vld [vmem:[#allocation2] sm:$0xff]  ;;  %s973_s0 = smov 120  }
   0xd   :  { %806 = vrcp.f32 %v972_v0  ;;  %v47_v3 = vsel %vm46_vm0, %v45_v2, 0.0  ;;  %v62_v5 = vmul.f32 %v45_v2, %v45_v2  ;;  %s974_s1 = smov 124   ;;  %s975_s24 = smov 4  }
   0xe   :  { %v48_v6 = vrot.slane %v47_v3, 4  ;;  %s976_s25 = smov 116   ;;  %s977_s26 = smov [#allocation7]  }
   0xf   :  { %v63_v8 = vsel %vm46_vm0, %v62_v5, 0.0  ;;  %s743_s27 = sshll.u32 %s977_s26, 4  ;;  %s745_s30 = sshll.u32 %s1148_s2, 4  ;;  %s744_s27 = int_to_ptr.vmem [resolvable:$true] %s743_s27  ;;  %s746_s30 = int_to_ptr.hbm [resolvable:$true] %s745_s30 }
  0x10   :  { %v49_v9 = vadd.f32 %v48_v6, %v47_v3  ;;  %v64_v10 = vrot.slane %v63_v8, 4 }
  0x12   :  { %v50_v12 = vrot.slane %v49_v9, 2  ;;  %v65_v13 = vadd.f32 %v64_v10, %v63_v8 }
  0x13   :  { %v807_v1 = vpop.eup %806 }
  0x14   :  { %v55_v4 = vmul.f32 8.0, %v807_v1  ;;  %v51_v15 = vadd.f32 %v50_v12, %v49_v9  ;;  %vm59_vm1 = vweird.f32 %v807_v1  ;;  %v66_v16 = vrot.slane %v65_v13, 2 }
  0x16   :  { %v56_v7 = vsub.f32 1.0, %v55_v4  ;;  %v52_v17 = vrot.slane %v51_v15, 1  ;;  %v67_v18 = vadd.f32 %v66_v16, %v65_v13 }
  0x18   :  { %v57_v11 = vmul.f32 %v807_v1, %v56_v7  ;;  %v53_v20 = vadd.f32 %v52_v17, %v51_v15  ;;  %v68_v21 = vrot.slane %v67_v18, 1 }
  0x1a   :  { %v58_v14 = vadd.f32 %v807_v1, %v57_v11  ;;  %v69_v23 = vadd.f32 %v68_v21, %v67_v18 }
  0x1c   :  { %v1008_v19 = vsel %vm59_vm1, %v807_v1, %v58_v14 }
  0x1d   :  { %v61_v22 = vmul.f32 %v1008_v19, %v53_v20  ;;  %v70_v24 = vmul.f32 %v69_v23, %v1008_v19 }
  0x1f   :  { %v71_v25 = vmul.f32 %v61_v22, %v61_v22  ;;  %v87_v46 = vsub.f32 %v45_v2, %v61_v22 }
  0x21   :  { %v72_v26 = vsub.f32 %v70_v24, %v71_v25 }
  0x23   :  { %v73_v27 = vmax.f32 %v72_v26, 0.0 }
  0x25   :  { %808 = vrsqrt.f32 %v73_v27  ;;  %vm81_vm2 = vcmp.eq.f32.partialorder %v73_v27, inf  ;;  %v84_v34 = vand.u32 2147483648, %v73_v27  ;;  %vm83_vm3 = vcmp.eq.f32.partialorder %v73_v27, 0.0 }
  0x2b   :  { %v809_v28 = vpop.eup %808 }
  0x2c   :  { %v75_v29 = vmul.f32 %v809_v28, %v73_v27 }
  0x2e   :  { %v76_v30 = vmul.f32 %v809_v28, %v75_v29 }
  0x30   :  { %v77_v31 = vmul.f32 0.5, %v76_v30 }
  0x32   :  { %v78_v32 = vsub.f32 1.5, %v77_v31 }
  0x34   :  { %v79_v33 = vmul.f32 %v809_v28, %v78_v32 }
  0x36   :  { %v80_v35 = vmul.f32 %v79_v33, %v73_v27 }
  0x38   :  { %v82_v36 = vsel %vm81_vm2, %v73_v27, %v80_v35 }
  0x39   :  { %v85_v37 = vsel %vm83_vm3, %v84_v34, %v82_v36 }
  0x3a   :  { %v1012_v38 = vadd.f32 1e-06, %v85_v37 }
  0x3c   :  { %810 = vrcp.f32 %v1012_v38  ;;  %v99_v41 = vand.u32 2147483648, %v1012_v38  ;;  %vm93_vm4 = vweird.f32 %v1012_v38  ;;  %v97_v43 = vand.u32 2147483647, %v1012_v38 }
  0x3e   :  { %v100_v45 = vor.u32 1.1754944e-38, %v99_v41  ;;  %vm98_vm7 = vcmp.eq.f32.partialorder %v97_v43, 8.507059e+37 }
  0x42   :  { %v811_v39 = vpop.eup %810 }
  0x43   :  { %v89_v40 = vmul.f32 %v811_v39, %v1012_v38  ;;  %vm94_vm5 = vweird.f32 %v811_v39 }
  0x44   :  { %vm95_vm6 = vmor %vm93_vm4, %vm94_vm5  ;;  %vm252_vm5 = vcmask 130112  }
  0x45   :  { %v90_v42 = vsub.f32 1.0, %v89_v40 }
  0x47   :  { %v91_v44 = vmul.f32 %v811_v39, %v90_v42 }
  0x49   :  { %v92_v47 = vadd.f32 %v811_v39, %v91_v44 }
  0x4b   :  { %v96_v48 = vsel %vm95_vm6, %v811_v39, %v92_v47 }
  0x4c   :  { %v101_v49 = vsel %vm98_vm7, %v100_v45, %v96_v48 }
  0x4d   :  { %v102_v50 = vmul.f32 %v101_v49, %v87_v46 }
  0x4f   :  { %v118_v51 = vsel %vm46_vm0, %v102_v50, 0.0  ;;  %v126_v52 = vmul.f32 %v102_v50, %v102_v50 }
  0x50   :  { %v119_v53 = vrot.slane %v118_v51, 4 }
  0x51   :  { %v127_v54 = vsel %vm46_vm0, %v126_v52, 0.0 }
  0x52   :  { %v120_v55 = vadd.f32 %v119_v53, %v118_v51  ;;  %v128_v56 = vrot.slane %v127_v54, 4 }
  0x54   :  { %v121_v57 = vrot.slane %v120_v55, 2  ;;  %v129_v58 = vadd.f32 %v128_v56, %v127_v54 }
  0x56   :  { %v122_v59 = vadd.f32 %v121_v57, %v120_v55  ;;  %v130_v60 = vrot.slane %v129_v58, 2 }
  0x58   :  { %v123_v61 = vrot.slane %v122_v59, 1  ;;  %v131_v62 = vadd.f32 %v130_v60, %v129_v58 }
  0x5a   :  { %v124_v63 = vadd.f32 %v123_v61, %v122_v59  ;;  %v132_v0 = vrot.slane %v131_v62, 1 }
  0x5c   :  { %v125_v1 = vmul.f32 %v124_v63, %v1008_v19  ;;  %v133_v2 = vadd.f32 %v132_v0, %v131_v62 }
  0x5e   :  { %v134_v3 = vmul.f32 %v133_v2, %v1008_v19  ;;  %v135_v4 = vmul.f32 %v125_v1, %v125_v1  ;;  %v151_v26 = vsub.f32 %v102_v50, %v125_v1 }
  0x60   :  { %v136_v5 = vsub.f32 %v134_v3, %v135_v4 }
  0x62   :  { %v137_v6 = vmax.f32 %v136_v5, 0.0 }
  0x64   :  { %812 = vrsqrt.f32 %v137_v6  ;;  %vm145_vm8 = vcmp.eq.f32.partialorder %v137_v6, inf  ;;  %v148_v13 = vand.u32 2147483648, %v137_v6  ;;  %vm147_vm9 = vcmp.eq.f32.partialorder %v137_v6, 0.0 }
  0x6a   :  { %v813_v7 = vpop.eup %812 }
  0x6b   :  { %v139_v8 = vmul.f32 %v813_v7, %v137_v6 }
  0x6d   :  { %v140_v9 = vmul.f32 %v813_v7, %v139_v8 }
  0x6f   :  { %v141_v10 = vmul.f32 0.5, %v140_v9 }
  0x71   :  { %v142_v11 = vsub.f32 1.5, %v141_v10 }
  0x73   :  { %v143_v12 = vmul.f32 %v813_v7, %v142_v11 }
  0x75   :  { %v144_v14 = vmul.f32 %v143_v12, %v137_v6 }
  0x77   :  { %v146_v15 = vsel %vm145_vm8, %v137_v6, %v144_v14 }
  0x78   :  { %v149_v16 = vsel %vm147_vm9, %v148_v13, %v146_v15 }
  0x79   :  { %v1023_v17 = vadd.f32 1e-06, %v149_v16 }
  0x7b   :  { %814 = vrcp.f32 %v1023_v17  ;;  %v163_v21 = vand.u32 2147483648, %v1023_v17  ;;  %vm157_vm10 = vweird.f32 %v1023_v17  ;;  %v161_v23 = vand.u32 2147483647, %v1023_v17 }
  0x7d   :  { %v164_v25 = vor.u32 1.1754944e-38, %v163_v21  ;;  %vm162_vm13 = vcmp.eq.f32.partialorder %v161_v23, 8.507059e+37 }
  0x81   :  { %v815_v18 = vpop.eup %814 }
  0x82   :  { %v153_v20 = vmul.f32 %v815_v18, %v1023_v17  ;;  %vm158_vm11 = vweird.f32 %v815_v18 }
  0x83   :  { %vm159_vm12 = vmor %vm157_vm10, %vm158_vm11 }
  0x84   :  { %v154_v22 = vsub.f32 1.0, %v153_v20 }
  0x86   :  { %v155_v24 = vmul.f32 %v815_v18, %v154_v22 }
  0x88   :  { %v156_v27 = vadd.f32 %v815_v18, %v155_v24 }
  0x8a   :  { %v160_v28 = vsel %vm159_vm12, %v815_v18, %v156_v27  ;;  %vm105_vm12 = vcmask 122880  }
  0x8b   :  { %v165_v29 = vsel %vm162_vm13, %v164_v25, %v160_v28  ;;  %vm247_vm13 = vcmask 64512  }
  0x8c   :  { %v166_v30 = vmul.f32 %v165_v29, %v151_v26 }
  0x8e   :  { %v181_v31 = vsel %vm46_vm0, %v166_v30, 0.0  ;;  %v189_v32 = vmul.f32 %v166_v30, %v166_v30 }
  0x8f   :  { %v182_v33 = vrot.slane %v181_v31, 4 }
  0x90   :  { %v190_v34 = vsel %vm46_vm0, %v189_v32, 0.0 }
  0x91   :  { %v183_v35 = vadd.f32 %v182_v33, %v181_v31  ;;  %v191_v36 = vrot.slane %v190_v34, 4 }
  0x93   :  { %v184_v37 = vrot.slane %v183_v35, 2  ;;  %v192_v39 = vadd.f32 %v191_v36, %v190_v34 }
  0x95   :  { %v185_v40 = vadd.f32 %v184_v37, %v183_v35  ;;  %v193_v41 = vrot.slane %v192_v39, 2 }
  0x97   :  { %v186_v42 = vrot.slane %v185_v40, 1  ;;  %v194_v43 = vadd.f32 %v193_v41, %v192_v39 }
  0x99   :  { %v187_v44 = vadd.f32 %v186_v42, %v185_v40  ;;  %v195_v45 = vrot.slane %v194_v43, 1 }
  0x9b   :  { %v188_v46 = vmul.f32 %v187_v44, %v1008_v19  ;;  %v196_v47 = vadd.f32 %v195_v45, %v194_v43 }
  0x9d   :  { %v197_v48 = vmul.f32 %v196_v47, %v1008_v19  ;;  %v198_v49 = vmul.f32 %v188_v46, %v188_v46  ;;  %v214_v6 = vsub.f32 %v166_v30, %v188_v46 }
  0x9f   :  { %v199_v50 = vsub.f32 %v197_v48, %v198_v49 }
  0xa1   :  { %v200_v51 = vmax.f32 %v199_v50, 0.0 }
  0xa3   :  { %816 = vrsqrt.f32 %v200_v51  ;;  %vm208_vm14 = vcmp.eq.f32.partialorder %v200_v51, inf  ;;  %v211_v58 = vand.u32 2147483648, %v200_v51  ;;  %vm210_vm15 = vcmp.eq.f32.partialorder %v200_v51, 0.0 }
  0xa9   :  { %v817_v52 = vpop.eup %816 }
  0xaa   :  { %v202_v53 = vmul.f32 %v817_v52, %v200_v51 }
  0xac   :  { %v203_v54 = vmul.f32 %v817_v52, %v202_v53 }
  0xae   :  { %v204_v55 = vmul.f32 0.5, %v203_v54 }
  0xb0   :  { %v205_v56 = vsub.f32 1.5, %v204_v55 }
  0xb2   :  { %v206_v57 = vmul.f32 %v817_v52, %v205_v56 }
  0xb4   :  { %v207_v59 = vmul.f32 %v206_v57, %v200_v51 }
  0xb6   :  { %v209_v60 = vsel %vm208_vm14, %v200_v51, %v207_v59 }
  0xb7   :  { %v212_v61 = vsel %vm210_vm15, %v211_v58, %v209_v60 }
  0xb8   :  { %v1034_v62 = vadd.f32 1e-06, %v212_v61 }
  0xba   :  { %818 = vrcp.f32 %v1034_v62  ;;  %v226_v1 = vand.u32 2147483648, %v1034_v62  ;;  %vm220_vm1 = vweird.f32 %v1034_v62  ;;  %v224_v3 = vand.u32 2147483647, %v1034_v62 }
  0xbc   :  { %v227_v5 = vor.u32 1.1754944e-38, %v226_v1  ;;  %vm225_vm4 = vcmp.eq.f32.partialorder %v224_v3, 8.507059e+37 }
  0xc0   :  { %v819_v63 = vpop.eup %818 }
  0xc1   :  { %v216_v0 = vmul.f32 %v819_v63, %v1034_v62  ;;  %vm221_vm2 = vweird.f32 %v819_v63 }
  0xc2   :  { %vm222_vm3 = vmor %vm220_vm1, %vm221_vm2 }
  0xc3   :  { %v217_v2 = vsub.f32 1.0, %v216_v0 }
  0xc5   :  { %v218_v4 = vmul.f32 %v819_v63, %v217_v2 }
  0xc7   :  { %v219_v7 = vadd.f32 %v819_v63, %v218_v4 }
  0xc9   :  { %v223_v8 = vsel %vm222_vm3, %v819_v63, %v219_v7 }
  0xca   :  { %v228_v9 = vsel %vm225_vm4, %v227_v5, %v223_v8 }
  0xcb   :  { %v1041_v10 = vmul.f32 %v228_v9, %v214_v6 }
  0xcd   :  { %v253_v11 = vsel %vm252_vm5, %v1041_v10, 0.0  ;;  %v261_v12 = vmul.f32 %v1041_v10, %v1041_v10 }
  0xce   :  { %v254_v13 = vrot.slane %v253_v11, 4 }
  0xcf   :  { %v262_v14 = vsel %vm252_vm5, %v261_v12, 0.0 }
  0xd0   :  { %v255_v15 = vadd.f32 %v254_v13, %v253_v11  ;;  %v263_v16 = vrot.slane %v262_v14, 4 }
  0xd2   :  { %v256_v18 = vrot.slane %v255_v15, 2  ;;  %v264_v20 = vadd.f32 %v263_v16, %v262_v14 }
  0xd4   :  { %v257_v21 = vadd.f32 %v256_v18, %v255_v15  ;;  %v265_v22 = vrot.slane %v264_v20, 2  ;;  %v244_v18 = vmul.f32 -0.5, %v1041_v10 }
  0xd6   :  { %v258_v23 = vrot.slane %v257_v21, 1  ;;  %v266_v24 = vadd.f32 %v265_v22, %v264_v20 }
  0xd8   :  { %v259_v25 = vadd.f32 %v258_v23, %v257_v21  ;;  %v267_v26 = vrot.slane %v266_v24, 1 }
  0xda   :  { %v260_v27 = vmul.f32 %v259_v25, %v1008_v19  ;;  %v268_v28 = vadd.f32 %v267_v26, %v266_v24  ;;  %v245_v24 = vmul.f32 %v244_v18, %v1041_v10 }
  0xdc   :  { %v269_v29 = vmul.f32 %v268_v28, %v1008_v19  ;;  %v270_v30 = vmul.f32 %v260_v27, %v260_v27  ;;  %v286_v54 = vsub.f32 %v1041_v10, %v260_v27  ;;  %v772_v28 = vadd.f32 -0.9189385, %v245_v24 }
  0xde   :  { %v271_v31 = vsub.f32 %v269_v29, %v270_v30 }
  0xe0   :  { %v272_v32 = vmax.f32 %v271_v31, 0.0  ;;  %v248_v31 = vsel %vm247_vm13, %v772_v28, 0.0 }
  0xe2   :  { %820 = vrsqrt.f32 %v272_v32  ;;  %vm280_vm6 = vcmp.eq.f32.partialorder %v272_v32, inf  ;;  %v283_v40 = vand.u32 2147483648, %v272_v32  ;;  %vm282_vm7 = vcmp.eq.f32.partialorder %v272_v32, 0.0 }
  0xe8   :  { %v821_v33 = vpop.eup %820 }
  0xe9   :  { %v274_v34 = vmul.f32 %v821_v33, %v272_v32 }
  0xeb   :  { %v275_v35 = vmul.f32 %v821_v33, %v274_v34 }
  0xed   :  { %v276_v36 = vmul.f32 0.5, %v275_v35 }
  0xef   :  { %v277_v37 = vsub.f32 1.5, %v276_v36 }
  0xf1   :  { %v278_v39 = vmul.f32 %v821_v33, %v277_v37 }
  0xf3   :  { %v279_v41 = vmul.f32 %v278_v39, %v272_v32 }
  0xf5   :  { %v281_v42 = vsel %vm280_vm6, %v272_v32, %v279_v41 }
  0xf6   :  { %v284_v43 = vsel %vm282_vm7, %v283_v40, %v281_v42 }
  0xf7   :  { %v285_v44 = vadd.f32 1e-06, %v284_v43 }
  0xf9   :  { %822 = vlog2.f32 %v285_v44  ;;  %v298_v49 = vand.u32 2147483648, %v285_v44  ;;  %vm292_vm8 = vweird.f32 %v285_v44  ;;  %v296_v51 = vand.u32 2147483647, %v285_v44 }
  0xfa   :  { %824 = vrcp.f32 %v285_v44 }
  0xfb   :  { %v299_v53 = vor.u32 1.1754944e-38, %v298_v49  ;;  %vm297_vm11 = vcmp.eq.f32.partialorder %v296_v51, 8.507059e+37 }
  0xff   :  { %v823_v45 = vpop.eup %822 }
 0x100   :  { %v825_v46 = vpop.eup %824  ;;  %v303_v47 = vmul.f32 0.6931472, %v823_v45 }
 0x101   :  { %v288_v48 = vmul.f32 %v825_v46, %v285_v44  ;;  %vm293_vm9 = vweird.f32 %v825_v46 }
 0x102   :  { %305 = vrot.lane.b32.xlu2 %v303_v47, %s973_s0  ;;  %vm294_vm10 = vmor %vm292_vm8, %vm293_vm9 }
 0x103   :  { %v289_v50 = vsub.f32 1.0, %v288_v48 }
 0x105   :  { %v290_v52 = vmul.f32 %v825_v46, %v289_v50 }
 0x107   :  { %v291_v55 = vadd.f32 %v825_v46, %v290_v52 }
 0x109   :  { %v295_v56 = vsel %vm294_vm10, %v825_v46, %v291_v55 }
 0x10a   :  { %v300_v57 = vsel %vm297_vm11, %v299_v53, %v295_v56  ;;  %vm467_vm11 = vcmask 97344  }
 0x10b   :  { %v1052_v58 = vmul.f32 %v300_v57, %v286_v54 }
 0x10d   :  { %v321_v59 = vsel %vm252_vm5, %v1052_v58, 0.0  ;;  %v329_v60 = vmul.f32 %v1052_v58, %v1052_v58 }
 0x10e   :  { %v322_v61 = vrot.slane %v321_v59, 4 }
 0x10f   :  { %v330_v63 = vsel %vm252_vm5, %v329_v60, 0.0 }
 0x110   :  { %v323_v0 = vadd.f32 %v322_v61, %v321_v59  ;;  %v331_v1 = vrot.slane %v330_v63, 4 }
 0x112   :  { %v324_v2 = vrot.slane %v323_v0, 2  ;;  %v332_v3 = vadd.f32 %v331_v1, %v330_v63 }
 0x114   :  { %v325_v4 = vadd.f32 %v324_v2, %v323_v0  ;;  %v333_v5 = vrot.slane %v332_v3, 2 }
 0x116   :  { %v326_v6 = vrot.slane %v325_v4, 1  ;;  %v334_v7 = vadd.f32 %v333_v5, %v332_v3 }
 0x118   :  { %v327_v8 = vadd.f32 %v326_v6, %v325_v4  ;;  %v335_v9 = vrot.slane %v334_v7, 1 }
 0x11a   :  { %v328_v11 = vmul.f32 %v327_v8, %v1008_v19  ;;  %v336_v12 = vadd.f32 %v335_v9, %v334_v7 }
 0x11c   :  { %v337_v13 = vmul.f32 %v336_v12, %v1008_v19  ;;  %v338_v14 = vmul.f32 %v328_v11, %v328_v11  ;;  %v354_v46 = vsub.f32 %v1052_v58, %v328_v11 }
 0x11e   :  { %v339_v15 = vsub.f32 %v337_v13, %v338_v14 }
 0x120   :  { %v340_v16 = vmax.f32 %v339_v15, 0.0 }
 0x122   :  { %826 = vrsqrt.f32 %v340_v16  ;;  %vm348_vm14 = vcmp.eq.f32.partialorder %v340_v16, inf  ;;  %vm350_vm15 = vcmp.eq.f32.partialorder %v340_v16, 0.0 }
 0x123   :  { %828 = vlog2.f32 %v1034_v62  ;;  %v351_v62 = vand.u32 2147483648, %v340_v16 }
 0x128   :  { %v827_v20 = vpop.eup %826 }
 0x129   :  { %v829_v21 = vpop.eup %828  ;;  %v342_v22 = vmul.f32 %v827_v20, %v340_v16 }
 0x12a   :  { %v231_v23 = vmul.f32 0.6931472, %v829_v21 }
 0x12b   :  { %v343_v25 = vmul.f32 %v827_v20, %v342_v22 }
 0x12c   :  { %v232_v26 = vsel %vm105_vm12, %v231_v23, 0.0 }
 0x12d   :  { %v344_v27 = vmul.f32 0.5, %v343_v25  ;;  %233 = vadd.xlane.f32.xlu1 %v232_v26 }
 0x12f   :  { %v345_v29 = vsub.f32 1.5, %v344_v27 }
 0x131   :  { %v346_v30 = vmul.f32 %v827_v20, %v345_v29 }
 0x133   :  { %v347_v32 = vmul.f32 %v346_v30, %v340_v16 }
 0x135   :  { %v349_v33 = vsel %vm348_vm14, %v340_v16, %v347_v32  ;;  %249 = vadd.xlane.f32.xlu1 %v248_v31 }
 0x136   :  { %v352_v34 = vsel %vm350_vm15, %v351_v62, %v349_v33 }
 0x137   :  { %v353_v35 = vadd.f32 1e-06, %v352_v34 }
 0x139   :  { %830 = vlog2.f32 %v353_v35  ;;  %v366_v41 = vand.u32 2147483648, %v353_v35  ;;  %vm360_vm1 = vweird.f32 %v353_v35  ;;  %v364_v43 = vand.u32 2147483647, %v353_v35 }
 0x13a   :  { %832 = vrcp.f32 %v353_v35 }
 0x13b   :  { %v367_v45 = vor.u32 1.1754944e-38, %v366_v41  ;;  %vm365_vm4 = vcmp.eq.f32.partialorder %v364_v43, 8.507059e+37 }
 0x13f   :  { %v831_v36 = vpop.eup %830 }
 0x140   :  { %v833_v37 = vpop.eup %832  ;;  %v371_v39 = vmul.f32 0.6931472, %v831_v36 }
 0x141   :  { %v356_v40 = vmul.f32 %v833_v37, %v353_v35  ;;  %vm361_vm2 = vweird.f32 %v833_v37 }
 0x142   :  { %373 = vrot.lane.b32.xlu2 %v371_v39, %s973_s0  ;;  %vm362_vm3 = vmor %vm360_vm1, %vm361_vm2  ;;  %vm308_vm1 = vcmask 57344  }
 0x143   :  { %v357_v42 = vsub.f32 1.0, %v356_v40 }
 0x145   :  { %v358_v44 = vmul.f32 %v833_v37, %v357_v42 }
 0x147   :  { %v359_v47 = vadd.f32 %v833_v37, %v358_v44 }
 0x149   :  { %v363_v48 = vsel %vm362_vm3, %v833_v37, %v359_v47 }
 0x14a   :  { %v368_v49 = vsel %vm365_vm4, %v367_v45, %v363_v48 }
 0x14b   :  { %v369_v50 = vmul.f32 %v368_v49, %v354_v46 }
 0x14d   :  { %v388_v51 = vsel %vm252_vm5, %v369_v50, 0.0  ;;  %v396_v52 = vmul.f32 %v369_v50, %v369_v50 }
 0x14e   :  { %v389_v53 = vrot.slane %v388_v51, 4 }
 0x14f   :  { %v397_v54 = vsel %vm252_vm5, %v396_v52, 0.0 }
 0x150   :  { %v390_v55 = vadd.f32 %v389_v53, %v388_v51  ;;  %v398_v56 = vrot.slane %v397_v54, 4 }
 0x152   :  { %v391_v57 = vrot.slane %v390_v55, 2  ;;  %v399_v59 = vadd.f32 %v398_v56, %v397_v54 }
 0x154   :  { %v392_v60 = vadd.f32 %v391_v57, %v390_v55  ;;  %v400_v61 = vrot.slane %v399_v59, 2 }
 0x156   :  { %v393_v63 = vrot.slane %v392_v60, 1  ;;  %v401_v0 = vadd.f32 %v400_v61, %v399_v59 }
 0x158   :  { %v394_v58 = vadd.f32 %v393_v63, %v392_v60  ;;  %v402_v1 = vrot.slane %v401_v0, 1 }
 0x15a   :  { %v395_v2 = vmul.f32 %v394_v58, %v1008_v19  ;;  %v403_v3 = vadd.f32 %v402_v1, %v401_v0 }
 0x15c   :  { %v404_v4 = vmul.f32 %v403_v3, %v1008_v19  ;;  %v405_v5 = vmul.f32 %v395_v2, %v395_v2  ;;  %v421_v29 = vsub.f32 %v369_v50, %v395_v2  ;;  %v306_v2 = vpop.permute.xlu2 %305 }
 0x15d   :  { %v309_v3 = vsel %vm308_vm1, %v306_v2, 0.0 }
 0x15e   :  { %v406_v6 = vsub.f32 %v404_v4, %v405_v5 }
 0x160   :  { %v407_v7 = vmax.f32 %v406_v6, 0.0 }
 0x162   :  { %834 = vrsqrt.f32 %v407_v7  ;;  %vm415_vm5 = vcmp.eq.f32.partialorder %v407_v7, inf  ;;  %v418_v15 = vand.u32 2147483648, %v407_v7  ;;  %vm417_vm6 = vcmp.eq.f32.partialorder %v407_v7, 0.0 }
 0x168   :  { %v835_v8 = vpop.eup %834 }
 0x169   :  { %v409_v9 = vmul.f32 %v835_v8, %v407_v7 }
 0x16b   :  { %v410_v11 = vmul.f32 %v835_v8, %v409_v9 }
 0x16d   :  { %v411_v12 = vmul.f32 0.5, %v410_v11 }
 0x16f   :  { %v412_v13 = vsub.f32 1.5, %v411_v12 }
 0x171   :  { %v413_v14 = vmul.f32 %v835_v8, %v412_v13 }
 0x173   :  { %v414_v16 = vmul.f32 %v413_v14, %v407_v7 }
 0x175   :  { %v416_v18 = vsel %vm415_vm5, %v407_v7, %v414_v16 }
 0x176   :  { %v419_v20 = vsel %vm417_vm6, %v418_v15, %v416_v18 }
 0x177   :  { %v1072_v21 = vadd.f32 1e-06, %v419_v20 }
 0x179   :  { %836 = vrcp.f32 %v1072_v21  ;;  %v433_v24 = vand.u32 2147483648, %v1072_v21  ;;  %vm427_vm7 = vweird.f32 %v1072_v21  ;;  %v431_v26 = vand.u32 2147483647, %v1072_v21 }
 0x17b   :  { %v434_v28 = vor.u32 1.1754944e-38, %v433_v24  ;;  %vm432_vm10 = vcmp.eq.f32.partialorder %v431_v26, 8.507059e+37 }
 0x17f   :  { %v837_v22 = vpop.eup %836 }
 0x180   :  { %v423_v23 = vmul.f32 %v837_v22, %v1072_v21  ;;  %vm428_vm8 = vweird.f32 %v837_v22 }
 0x181   :  { %vm429_vm9 = vmor %vm427_vm7, %vm428_vm8 }
 0x182   :  { %v424_v25 = vsub.f32 1.0, %v423_v23 }
 0x184   :  { %v425_v27 = vmul.f32 %v837_v22, %v424_v25 }
 0x186   :  { %v426_v30 = vadd.f32 %v837_v22, %v425_v27 }
 0x188   :  { %v430_v62 = vsel %vm429_vm9, %v837_v22, %v426_v30 }
 0x189   :  { %v435_v31 = vsel %vm432_vm10, %v434_v28, %v430_v62 }
 0x18a   :  { %v1079_v32 = vmul.f32 %v435_v31, %v421_v29 }
 0x18c   :  { %702 = vrot.lane.b32.xlu2 %v1079_v32, %s974_s1  ;;  %v468_v33 = vsel %vm467_vm11, %v1079_v32, 0.0  ;;  %v476_v34 = vmul.f32 %v1079_v32, %v1079_v32 }
 0x18d   :  { %v469_v35 = vrot.slane %v468_v33, 4 }
 0x18e   :  { %v477_v36 = vsel %vm467_vm11, %v476_v34, 0.0 }
 0x18f   :  { %v470_v37 = vadd.f32 %v469_v35, %v468_v33  ;;  %v478_v39 = vrot.slane %v477_v36, 4 }
 0x191   :  { %v471_v40 = vrot.slane %v470_v37, 2  ;;  %v479_v41 = vadd.f32 %v478_v39, %v477_v36 }
 0x193   :  { %v472_v42 = vadd.f32 %v471_v40, %v470_v37  ;;  %v480_v43 = vrot.slane %v479_v41, 2 }
 0x195   :  { %v473_v44 = vrot.slane %v472_v42, 1  ;;  %v481_v45 = vadd.f32 %v480_v43, %v479_v41 }
 0x197   :  { %v474_v46 = vadd.f32 %v473_v44, %v472_v42  ;;  %v482_v47 = vrot.slane %v481_v45, 1 }
 0x199   :  { %v475_v48 = vmul.f32 %v474_v46, %v1008_v19  ;;  %v483_v49 = vadd.f32 %v482_v47, %v481_v45 }
 0x19b   :  { %v484_v50 = vmul.f32 %v483_v49, %v1008_v19  ;;  %v485_v51 = vmul.f32 %v475_v48, %v475_v48  ;;  %v501_v16 = vsub.f32 %v1079_v32, %v475_v48 }
 0x19d   :  { %v486_v52 = vsub.f32 %v484_v50, %v485_v51  ;;  %v374_v50 = vpop.permute.xlu2 %373 }
 0x19e   :  { %v376_v51 = vsel %vm308_vm1, %v374_v50, 0.0 }
 0x19f   :  { %v487_v53 = vmax.f32 %v486_v52, 0.0 }
 0x1a1   :  { %838 = vrsqrt.f32 %v487_v53  ;;  %vm495_vm14 = vcmp.eq.f32.partialorder %v487_v53, inf  ;;  %v498_v61 = vand.u32 2147483648, %v487_v53  ;;  %vm497_vm15 = vcmp.eq.f32.partialorder %v487_v53, 0.0 }
 0x1a7   :  { %v839_v54 = vpop.eup %838 }
 0x1a8   :  { %v489_v55 = vmul.f32 %v839_v54, %v487_v53 }
 0x1aa   :  { %v490_v56 = vmul.f32 %v839_v54, %v489_v55 }
 0x1ac   :  { %v491_v57 = vmul.f32 0.5, %v490_v56 }
 0x1ae   :  { %v492_v59 = vsub.f32 1.5, %v491_v57 }
 0x1b0   :  { %v493_v60 = vmul.f32 %v839_v54, %v492_v59 }
 0x1b2   :  { %v494_v63 = vmul.f32 %v493_v60, %v487_v53 }
 0x1b4   :  { %v496_v0 = vsel %vm495_vm14, %v487_v53, %v494_v63 }
 0x1b5   :  { %v499_v58 = vsel %vm497_vm15, %v498_v61, %v496_v0  ;;  %310 = vadd.xlane.f32.xlu2 %v309_v3 }
 0x1b6   :  { %v500_v1 = vadd.f32 1e-06, %v499_v58 }
 0x1b8   :  { %840 = vrcp.f32 %v500_v1  ;;  %vm507_vm2 = vweird.f32 %v500_v1  ;;  %v513_v8 = vand.u32 2147483648, %v500_v1  ;;  %v511_v12 = vand.u32 2147483647, %v500_v1 }
 0x1b9   :  { %842 = vlog2.f32 %v500_v1 }
 0x1ba   :  { %844 = vlog2.f32 %v1012_v38  ;;  %vm512_vm5 = vcmp.eq.f32.partialorder %v511_v12, 8.507059e+37 }
 0x1bb   :  { %846 = vlog2.f32 %v1023_v17  ;;  %v514_v17 = vor.u32 1.1754944e-38, %v513_v8 }
 0x1bc   :  { %848 = vlog2.f32 %v1072_v21 }
 0x1be   :  { %v841_v4 = vpop.eup %840 }
 0x1bf   :  { %v843_v5 = vpop.eup %842  ;;  %v503_v6 = vmul.f32 %v841_v4, %v500_v1  ;;  %vm508_vm3 = vweird.f32 %v841_v4 }
 0x1c0   :  { %v845_v7 = vpop.eup %844  ;;  %v518_v9 = vmul.f32 0.6931472, %v843_v5  ;;  %vm509_vm4 = vmor %vm507_vm2, %vm508_vm3 }
 0x1c1   :  { %v504_v11 = vsub.f32 1.0, %v503_v6  ;;  %v104_v13 = vmul.f32 0.6931472, %v845_v7  ;;  %v847_v14 = vpop.eup %846 }
 0x1c2   :  { %520 = vrot.lane.b32.xlu1 %v518_v9, %s973_s0  ;;  %v168_v20 = vmul.f32 0.6931472, %v847_v14  ;;  %v849_v43 = vpop.eup %848 }
 0x1c3   :  { %v505_v38 = vmul.f32 %v841_v4, %v504_v11  ;;  %v106_v15 = vsel %vm105_vm12, %v104_v13, 0.0  ;;  %v438_v46 = vmul.f32 0.6931472, %v849_v43 }
 0x1c4   :  { %107 = vadd.xlane.f32.xlu0 %v106_v15  ;;  %v169_v25 = vsel %vm105_vm12, %v168_v20, 0.0 }
 0x1c5   :  { %v506_v18 = vadd.f32 %v841_v4, %v505_v38 }
 0x1c7   :  { %v510_v22 = vsel %vm509_vm4, %v841_v4, %v506_v18 }
 0x1c8   :  { %v515_v23 = vsel %vm512_vm5, %v514_v17, %v510_v22  ;;  %vm523_vm5 = vcmask 24576  }
 0x1c9   :  { %v1095_v24 = vmul.f32 %v515_v23, %v501_v16 }
 0x1cb   :  { %v536_v26 = vsel %vm467_vm11, %v1095_v24, 0.0  ;;  %v544_v27 = vmul.f32 %v1095_v24, %v1095_v24 }
 0x1cc   :  { %v537_v28 = vrot.slane %v536_v26, 4  ;;  %170 = vadd.xlane.f32.xlu0 %v169_v25 }
 0x1cd   :  { %v545_v29 = vsel %vm467_vm11, %v544_v27, 0.0 }
 0x1ce   :  { %v538_v30 = vadd.f32 %v537_v28, %v536_v26  ;;  %v546_v62 = vrot.slane %v545_v29, 4 }
 0x1d0   :  { %v539_v31 = vrot.slane %v538_v30, 2  ;;  %v547_v33 = vadd.f32 %v546_v62, %v545_v29 }
 0x1d2   :  { %v540_v34 = vadd.f32 %v539_v31, %v538_v30  ;;  %v548_v35 = vrot.slane %v547_v33, 2 }
 0x1d4   :  { %v541_v36 = vrot.slane %v540_v34, 1  ;;  %v549_v37 = vadd.f32 %v548_v35, %v547_v33 }
 0x1d6   :  { %v542_v39 = vadd.f32 %v541_v36, %v540_v34  ;;  %v550_v40 = vrot.slane %v549_v37, 1 }
 0x1d8   :  { %v543_v41 = vmul.f32 %v542_v39, %v1008_v19  ;;  %v551_v42 = vadd.f32 %v550_v40, %v549_v37 }
 0x1da   :  { %v552_v44 = vmul.f32 %v551_v42, %v1008_v19  ;;  %v553_v45 = vmul.f32 %v543_v41, %v543_v41  ;;  %v569_v7 = vsub.f32 %v1095_v24, %v543_v41 }
 0x1dc   :  { %v554_v47 = vsub.f32 %v552_v44, %v553_v45 }
 0x1de   :  { %v555_v48 = vmax.f32 %v554_v47, 0.0 }
 0x1e0   :  { %440 = vrot.lane.b32.xlu0 %v438_v46, %s973_s0  ;;  %850 = vrsqrt.f32 %v555_v48  ;;  %vm563_vm12 = vcmp.eq.f32.partialorder %v555_v48, inf  ;;  %v566_v56 = vand.u32 2147483648, %v555_v48  ;;  %vm565_vm6 = vcmp.eq.f32.partialorder %v555_v48, 0.0 }
 0x1e6   :  { %v851_v49 = vpop.eup %850 }
 0x1e7   :  { %v557_v21 = vmul.f32 %v851_v49, %v555_v48 }
 0x1e9   :  { %v558_v52 = vmul.f32 %v851_v49, %v557_v21 }
 0x1eb   :  { %v559_v53 = vmul.f32 0.5, %v558_v52 }
 0x1ec   :  { %377 = vadd.xlane.f32.xlu1 %v376_v51  ;;  %v1115_v51 = vpop.permute.xlu2 %702 }
 0x1ed   :  { %v560_v54 = vsub.f32 1.5, %v559_v53 }
 0x1ef   :  { %v561_v55 = vmul.f32 %v851_v49, %v560_v54 }
 0x1f1   :  { %v562_v57 = vmul.f32 %v561_v55, %v555_v48  ;;  %v234_v55 = vpop.xlane.xlu1 %233 }
 0x1f3   :  { %v564_v59 = vsel %vm563_vm12, %v555_v48, %v562_v57  ;;  %vm462_vm12 = vcmask 31744  }
 0x1f4   :  { %v567_v60 = vsel %vm565_vm6, %v566_v56, %v564_v59 }
 0x1f5   :  { %v568_v61 = vadd.f32 1e-06, %v567_v60 }
 0x1f7   :  { %852 = vlog2.f32 %v568_v61  ;;  %v581_v2 = vand.u32 2147483648, %v568_v61  ;;  %vm575_vm7 = vweird.f32 %v568_v61  ;;  %v579_v4 = vand.u32 2147483647, %v568_v61 }
 0x1f8   :  { %854 = vrcp.f32 %v568_v61 }
 0x1f9   :  { %v582_v6 = vor.u32 1.1754944e-38, %v581_v2  ;;  %vm580_vm10 = vcmp.eq.f32.partialorder %v579_v4, 8.507059e+37 }
 0x1fd   :  { %v853_v63 = vpop.eup %852 }
 0x1fe   :  { %v855_v0 = vpop.eup %854  ;;  %v586_v58 = vmul.f32 0.6931472, %v853_v63 }
 0x1ff   :  { %v571_v1 = vmul.f32 %v855_v0, %v568_v61  ;;  %vm576_vm8 = vweird.f32 %v855_v0 }
 0x200   :  { %588 = vrot.lane.b32.xlu2 %v586_v58, %s973_s0  ;;  %vm577_vm9 = vmor %vm575_vm7, %vm576_vm8 }
 0x201   :  { %v572_v3 = vsub.f32 1.0, %v571_v1 }
 0x203   :  { %v573_v5 = vmul.f32 %v855_v0, %v572_v3 }
 0x205   :  { %v574_v8 = vadd.f32 %v855_v0, %v573_v5 }
 0x207   :  { %v578_v9 = vsel %vm577_vm9, %v855_v0, %v574_v8  ;;  %v235_v0 = vrot.slane %v234_v55, 4 }
 0x208   :  { %v583_v11 = vsel %vm580_vm10, %v582_v6, %v578_v9  ;;  %v1120_v6 = vpop.xlane.xlu1 %249 }
 0x209   :  { %v584_v12 = vmul.f32 %v583_v11, %v569_v7  ;;  %v236_v5 = vadd.f32 %v235_v0, %v234_v55 }
 0x20b   :  { %v603_v13 = vsel %vm467_vm11, %v584_v12, 0.0  ;;  %v611_v14 = vmul.f32 %v584_v12, %v584_v12  ;;  %v237_v11 = vrot.slane %v236_v5, 2 }
 0x20c   :  { %v604_v38 = vrot.slane %v603_v13, 4 }
 0x20d   :  { %v612_v15 = vsel %vm467_vm11, %v611_v14, 0.0 }
 0x20e   :  { %v605_v17 = vadd.f32 %v604_v38, %v603_v13  ;;  %v613_v16 = vrot.slane %v612_v15, 4 }
 0x210   :  { %v606_v18 = vrot.slane %v605_v17, 2  ;;  %v614_v20 = vadd.f32 %v613_v16, %v612_v15 }
 0x212   :  { %v607_v22 = vadd.f32 %v606_v18, %v605_v17  ;;  %v615_v23 = vrot.slane %v614_v20, 2  ;;  %v238_v17 = vadd.f32 %v237_v11, %v236_v5 }
 0x214   :  { %v608_v25 = vrot.slane %v607_v22, 1  ;;  %v616_v26 = vadd.f32 %v615_v23, %v614_v20  ;;  %v239_v23 = vrot.slane %v238_v17, 1 }
 0x216   :  { %v609_v24 = vadd.f32 %v608_v25, %v607_v22  ;;  %v617_v27 = vrot.slane %v616_v26, 1 }
 0x218   :  { %v610_v28 = vmul.f32 %v609_v24, %v1008_v19  ;;  %v618_v29 = vadd.f32 %v617_v27, %v616_v26  ;;  %v240_v27 = vadd.f32 %v239_v23, %v238_v17 }
 0x21a   :  { %v619_v30 = vmul.f32 %v618_v29, %v1008_v19  ;;  %v620_v62 = vmul.f32 %v610_v28, %v610_v28  ;;  %v636_v57 = vsub.f32 %v584_v12, %v610_v28 }
 0x21c   :  { %v621_v31 = vsub.f32 %v619_v30, %v620_v62 }
 0x21e   :  { %v622_v33 = vmax.f32 %v621_v31, 0.0 }
 0x220   :  { %856 = vrsqrt.f32 %v622_v33  ;;  %vm630_vm11 = vcmp.eq.f32.partialorder %v622_v33, inf  ;;  %v633_v41 = vand.u32 2147483648, %v622_v33  ;;  %vm632_vm14 = vcmp.eq.f32.partialorder %v622_v33, 0.0 }
 0x226   :  { %v857_v34 = vpop.eup %856 }
 0x227   :  { %v624_v35 = vmul.f32 %v857_v34, %v622_v33 }
 0x228   :  { %v311_v2 = vpop.xlane.xlu2 %310 }
 0x229   :  { %v625_v36 = vmul.f32 %v857_v34, %v624_v35  ;;  %v312_v4 = vrot.slane %v311_v2, 4 }
 0x22b   :  { %v626_v37 = vmul.f32 0.5, %v625_v36  ;;  %v313_v9 = vadd.f32 %v312_v4, %v311_v2 }
 0x22d   :  { %v627_v39 = vsub.f32 1.5, %v626_v37  ;;  %v314_v14 = vrot.slane %v313_v9, 2 }
 0x22f   :  { %v628_v40 = vmul.f32 %v857_v34, %v627_v39  ;;  %v315_v16 = vadd.f32 %v314_v14, %v313_v9 }
 0x231   :  { %v629_v42 = vmul.f32 %v628_v40, %v622_v33  ;;  %v316_v25 = vrot.slane %v315_v16, 1 }
 0x233   :  { %v631_v43 = vsel %vm630_vm11, %v622_v33, %v629_v42  ;;  %v317_v29 = vadd.f32 %v316_v25, %v315_v16  ;;  %v455_v42 = vmul.f32 -0.5, %v1079_v32 }
 0x234   :  { %v634_v44 = vsel %vm632_vm14, %v633_v41, %v631_v43  ;;  %v521_v18 = vpop.permute.xlu1 %520 }
 0x235   :  { %v635_v45 = vadd.f32 1e-06, %v634_v44  ;;  %v524_v35 = vsel %vm523_vm5, %v521_v18, 0.0  ;;  %v456_v43 = vmul.f32 %v455_v42, %v1079_v32  ;;  %v709_v32 = vsel %vm247_vm13, %v1041_v10, %v1115_v51 }
 0x236   :  { %vm699_vm13 = vcmask 0  }
 0x237   :  { %858 = vlog2.f32 %v635_v45  ;;  %v108_v50 = vpop.xlane.xlu0 %107  ;;  %v648_v21 = vand.u32 2147483648, %v635_v45  ;;  %vm642_vm15 = vweird.f32 %v635_v45  ;;  %v646_v53 = vand.u32 2147483647, %v635_v45 }
 0x238   :  { %860 = vrcp.f32 %v635_v45  ;;  %v109_v58 = vrot.slane %v108_v50, 4  ;;  %v773_v44 = vadd.f32 -0.9189385, %v456_v43 }
 0x239   :  { %v649_v56 = vor.u32 1.1754944e-38, %v648_v21  ;;  %vm647_vm4 = vcmp.eq.f32.partialorder %v646_v53, 8.507059e+37 }
 0x23a   :  { %v110_v7 = vadd.f32 %v109_v58, %v108_v50 }
 0x23c   :  { %v111_v12 = vrot.slane %v110_v7, 2 }
 0x23d   :  { %v859_v46 = vpop.eup %858 }
 0x23e   :  { %v861_v47 = vpop.eup %860  ;;  %v653_v48 = vmul.f32 0.6931472, %v859_v46  ;;  %v112_v38 = vadd.f32 %v111_v12, %v110_v7 }
 0x23f   :  { %v638_v49 = vmul.f32 %v861_v47, %v635_v45  ;;  %vm643_vm2 = vweird.f32 %v861_v47  ;;  %v171_v1 = vpop.xlane.xlu0 %170  ;;  %v713_v45 = vld [vmem:[#allocation5 + $0x8] sm:$0xff] }
 0x240   :  { %655 = vrot.lane.b32.xlu2 %v653_v48, %s973_s0  ;;  %vm644_vm3 = vmor %vm642_vm15, %vm643_vm2  ;;  %v172_v3 = vrot.slane %v171_v1, 4  ;;  %v113_v20 = vrot.slane %v112_v38, 1  ;;  %731 = vmatpush.msra.mxu0 %v713_v45  ;;  %v712_v48 = vld [vmem:[#allocation5] sm:$0xff] }
 0x241   :  { %v639_v52 = vsub.f32 1.0, %v638_v49 }
 0x242   :  { %v173_v8 = vadd.f32 %v172_v3, %v171_v1  ;;  %v114_v26 = vadd.f32 %v113_v20, %v112_v38  ;;  %732 = vmatpush.msra.mxu0 %v712_v48 }
 0x243   :  { %v640_v54 = vmul.f32 %v861_v47, %v639_v52 }
 0x244   :  { %v174_v13 = vrot.slane %v173_v8, 2  ;;  %776 = vpush %v114_v26  ;;  %v978_v26 = vmov 11.090355  }
 0x245   :  { %v641_v59 = vadd.f32 %v861_v47, %v640_v54  ;;  %862 = vrcp.f32 %v978_v26 }
 0x246   :  { %v175_v15 = vadd.f32 %v174_v13, %v173_v8 }
 0x247   :  { %v645_v60 = vsel %vm644_vm3, %v861_v47, %v641_v59 }
 0x248   :  { %v650_v61 = vsel %vm647_vm4, %v649_v56, %v645_v60  ;;  %v176_v22 = vrot.slane %v175_v15, 1 }
 0x249   :  { %v1117_v63 = vmul.f32 %v650_v61, %v636_v57 }
 0x24a   :  { %v177_v24 = vadd.f32 %v176_v22, %v175_v15 }
 0x24b   :  { %706 = vrot.lane.b32.xlu0 %v1117_v63, %s975_s24  ;;  %v670_v49 = vmul.f32 -0.5, %v1117_v63 }
 0x24c   :  { %778 = vpush %v177_v24  ;;  %v863_v24 = vpop.eup %862 }
 0x24d   :  { %780 = vpush %v240_v27  ;;  %v671_v50 = vmul.f32 %v670_v49, %v1117_v63  ;;  %v685_v27 = vmul.f32 11.090355, %v863_v24 }
 0x24e   :  { %782 = vpush %v317_v29 }
 0x24f   :  { %v774_v21 = vadd.f32 -0.9189385, %v671_v50  ;;  %v686_v29 = vsub.f32 1.0, %v685_v27 }
 0x252   :  { %v441_v40 = vpop.permute.xlu0 %440 }
 0x253   :  { %v443_v41 = vsel %vm308_vm1, %v441_v40, 0.0  ;;  %vm710_vm1 = vcmask 97280  }
 0x25a   :  { %v589_v28 = vpop.permute.xlu2 %588 }
 0x25b   :  { %v591_v30 = vsel %vm523_vm5, %v589_v28, 0.0 }
 0x25c   :  { %592 = vadd.xlane.f32.xlu1 %v591_v30  ;;  %v687_v30 = vmul.f32 %v863_v24, %v686_v29 }
 0x25f   :  { %v378_v62 = vpop.xlane.xlu1 %377 }
 0x260   :  { %v379_v31 = vrot.slane %v378_v62, 4 }
 0x262   :  { %v380_v33 = vadd.f32 %v379_v31, %v378_v62  ;;  %v688_v31 = vadd.f32 %v863_v24, %v687_v30 }
 0x264   :  { %v381_v34 = vrot.slane %v380_v33, 2 }
 0x266   :  { %v382_v36 = vadd.f32 %v381_v34, %v380_v33 }
 0x268   :  { %v383_v37 = vrot.slane %v382_v36, 1 }
 0x269   :  { %525 = vadd.xlane.f32.xlu2 %v524_v35 }
 0x26a   :  { %v384_v39 = vadd.f32 %v383_v37, %v382_v36 }
 0x26c   :  { %784 = vpush %v384_v39 }
 0x275   :  { %444 = vadd.xlane.f32.xlu0 %v443_v41  ;;  %s777_s4 = spop %776 }
 0x276   :  { %s116_s6 = ssub.f32 0.0, %s777_s4  ;;  %s756_s4 = sshll.u32 %s1149_s3, 4  ;;  %s757_s4 = int_to_ptr.hbm [resolvable:$true] %s756_s4 }
 0x27d   :  { %s779_s5 = spop %778 }
 0x27e   :  { %s179_s7 = ssub.f32 0.0, %s779_s5  ;;  %s781_s8 = spop %780 }
 0x27f   :  { %s242_s9 = ssub.f32 0.0, %s781_s8  ;;  %s783_s11 = spop %782 }
 0x280   :  { %s180_s10 = sadd.f32 %s179_s7, %s116_s6 }
 0x281   :  { %459 = vrot.lane.b32.xlu2 %v773_v44, %s976_s25  ;;  %s319_s12 = ssub.f32 0.0, %s783_s11 }
 0x282   :  { %s243_s13 = sadd.f32 %s242_s9, %s180_s10 }
 0x284   :  { %s320_s2 = sadd.f32 %s319_s12, %s243_s13 }
 0x29a   :  { %v656_v46 = vpop.permute.xlu2 %655 }
 0x29b   :  { %v658_v47 = vsel %vm523_vm5, %v656_v46, 0.0 }
 0x29c   :  { %659 = vadd.xlane.f32.xlu0 %v658_v47 }
 0x29d   :  { %s785_s14 = spop %784 }
 0x29e   :  { %s386_s16 = ssub.f32 0.0, %s785_s14 }
 0x2a0   :  { %s387_s19 = sadd.f32 %s386_s16, %s320_s2 }
 0x2b0   :  { %674 = vrot.lane.b32.xlu0 %v774_v21, %s973_s0 }
 0x2bd   :  { %v707_v52 = vpop.permute.xlu0 %706 }
 0x2be   :  { %v711_v53 = vsel %vm710_vm1, %v709_v32, %v707_v52 }
 0x2bf   :  { %775 = vmatmul.msk.f32.vlgmr.msra.gmra.mxu0 %vm46_vm0, %v711_v53 }
 0x2cf   :  { %v593_v55 = vpop.xlane.xlu1 %592 }
 0x2d0   :  { %v594_v57 = vrot.slane %v593_v55, 4 }
 0x2d2   :  { %v595_v60 = vadd.f32 %v594_v57, %v593_v55 }
 0x2d4   :  { %v596_v58 = vrot.slane %v595_v60, 2 }
 0x2d6   :  { %v597_v3 = vadd.f32 %v596_v58, %v595_v60 }
 0x2d8   :  { %v598_v8 = vrot.slane %v597_v3, 1 }
 0x2da   :  { %v599_v13 = vadd.f32 %v598_v8, %v597_v3 }
 0x2dc   :  { %v526_v54 = vpop.xlane.xlu2 %525 }
 0x2dd   :  { %v527_v56 = vrot.slane %v526_v54, 4 }
 0x2df   :  { %v528_v59 = vadd.f32 %v527_v56, %v526_v54 }
 0x2e1   :  { %v529_v0 = vrot.slane %v528_v59, 2 }
 0x2e3   :  { %v530_v10 = vadd.f32 %v529_v0, %v528_v59 }
 0x2e4   :  { %v460_v61 = vpop.permute.xlu2 %459 }
 0x2e5   :  { %v463_v63 = vsel %vm462_vm12, %v460_v61, 0.0  ;;  %v531_v5 = vrot.slane %v530_v10, 1 }
 0x2e6   :  { %464 = vadd.xlane.f32.xlu1 %v463_v63 }
 0x2e7   :  { %v532_v11 = vadd.f32 %v531_v5, %v530_v10 }
 0x2e8   :  { %v445_v1 = vpop.xlane.xlu0 %444 }
 0x2e9   :  { %v446_v2 = vrot.slane %v445_v1, 4 }
 0x2eb   :  { %v447_v51 = vadd.f32 %v446_v2, %v445_v1 }
 0x2ed   :  { %v448_v4 = vrot.slane %v447_v51, 2 }
 0x2ef   :  { %v449_v7 = vadd.f32 %v448_v4, %v447_v51 }
 0x2f1   :  { %v450_v9 = vrot.slane %v449_v7, 1 }
 0x2f3   :  { %v451_v12 = vadd.f32 %v450_v9, %v449_v7 }
 0x2f5   :  { %786 = vpush %v451_v12 }
 0x2f6   :  { %788 = vpush %v532_v11 }
 0x2f7   :  { %790 = vpush %v599_v13 }
 0x30f   :  { %v660_v14 = vpop.xlane.xlu0 %659 }
 0x310   :  { %v661_v38 = vrot.slane %v660_v14, 4 }
 0x312   :  { %v662_v15 = vadd.f32 %v661_v38, %v660_v14 }
 0x314   :  { %v663_v17 = vrot.slane %v662_v15, 2 }
 0x316   :  { %v664_v16 = vadd.f32 %v663_v17, %v662_v15 }
 0x318   :  { %v665_v18 = vrot.slane %v664_v16, 1 }
 0x31a   :  { %v666_v20 = vadd.f32 %v665_v18, %v664_v16 }
 0x31c   :  { %792 = vpush %v666_v20 }
 0x322   :  { %v675_v22 = vpop.permute.xlu0 %674 }
 0x323   :  { %v677_v23 = vsel %vm462_vm12, %v675_v22, 0.0 }
 0x324   :  { %678 = vadd.xlane.f32.xlu1 %v677_v23 }
 0x326   :  { %s787_s15 = spop %786 }
 0x327   :  { %s453_s17 = ssub.f32 0.0, %s787_s15  ;;  %s789_s18 = spop %788 }
 0x328   :  { %s534_s20 = ssub.f32 0.0, %s789_s18  ;;  %s791_s22 = spop %790 }
 0x329   :  { %s454_s21 = sadd.f32 %s453_s17, %s387_s19 }
 0x32a   :  { %s601_s23 = ssub.f32 0.0, %s791_s22 }
 0x32b   :  { %s535_s1 = sadd.f32 %s534_s20, %s454_s21 }
 0x32d   :  { %s602_s25 = sadd.f32 %s601_s23, %s535_s1 }
 0x33c   :  { %v734_v25 = vpop.f32.mrf.mxu0 }
 0x33d   :  { %737 = vst.msk [vmem:[#allocation7] sm:$0xff] %vm46_vm0, %v734_v25  ;;  %vm689_vm0 = vweird.f32 %v863_v24 }
 0x33e   :  { %748 = dma.vmem_to_hbm [thread:$0]  %s744_s27, 128, %s746_s30, [#allocation4]   ;;  %v690_v37 = vsel %vm689_vm0, %v863_v24, %v688_v31 }
 0x33f   :  { %s979_s27 = smov [#allocation8]  }
 0x340   :  { %s754_s28 = sshll.u32 %s979_s27, 4  ;;  %s755_s28 = int_to_ptr.vmem [resolvable:$true] %s754_s28 }
 0x34d   :  { %s793_s0 = spop %792 }
 0x34e   :  { %s668_s24 = ssub.f32 0.0, %s793_s0 }
 0x350   :  { %s669_s26 = sadd.f32 %s668_s24, %s602_s25 }
 0x352   :  { %v681_v35 = vstv %s669_s26 }
 0x359   :  { %v465_v28 = vpop.xlane.xlu1 %464 }
 0x35a   :  { %v466_v62 = vadd.f32 %v465_v28, %v1120_v6 }
 0x397   :  { %v679_v33 = vpop.xlane.xlu1 %678 }
 0x398   :  { %v680_v34 = vadd.f32 %v679_v33, %v466_v62 }
 0x39a   :  { %v682_v36 = vadd.f32 %v681_v35, %v680_v34 }
 0x39c   :  { %v683_v39 = vsub.f32 0.0, %v682_v36 }
 0x39e   :  { %v691_v40 = vmul.f32 %v690_v37, %v683_v39 }
 0x3a0   :  { %v692_v41 = vrot.slane %v691_v40, 4 }
 0x3a2   :  { %v693_v42 = vadd.f32 %v692_v41, %v691_v40 }
 0x3a4   :  { %v694_v43 = vrot.slane %v693_v42, 2 }
 0x3a6   :  { %v695_v44 = vadd.f32 %v694_v43, %v693_v42 }
 0x3a8   :  { %v696_v45 = vrot.slane %v695_v44, 1 }
 0x3aa   :  { %v697_v6 = vadd.f32 %v696_v45, %v695_v44 }
 0x3ac   :  { %v698_v46 = vmul.f32 %v697_v6, %v1008_v19 }
 0x3ae   :  { %700 = vst.msk [vmem:[#allocation8] sm:$0x1] %vm699_vm13, %v698_v46 }
 0x3af   :  { %759 = dma.vmem_to_hbm [thread:$0]  %s755_s28, 16, %s757_s4, [#allocation9]  }
 0x3b0   :  { %964 = dma.done.wait [#allocation4], 128  }
 0x3b1   :  { %965 = vsyncadd [#allocation4], 4294967168 }
 0x3b2   :  { %966 = dma.done.wait [#allocation9], 16  }
 0x3b3   :  { %967 = vsyncadd [#allocation9], 4294967280 }
 0x3b4   :  { %768 = vsyncpa [#allocation3], 1 }
 0x3b5   :  { %769 = vsyncpa [#allocation6], 1 }
 0x3b6   :  { %770 = vsyncpa [#allocation4], 1 }
 0x3b7   :  { %771 = vsyncpa [#allocation9], 1 }

</bundles_post_ra>
